<compile_context>
chip_gen: v7x
topology: tpu7x:2x2x1
jax: 0.10.0
libtpu: 0.0.40
codegen_flags: <defaults>
</compile_context>

<pallas_src>
import functools

import jax
import jax.numpy as jnp
from jax import lax
from jax.experimental import pallas as pl
from jax.experimental.pallas import tpu as pltpu


# ---------------------------------------------------------------------------
# Kernels
# ---------------------------------------------------------------------------
def _dwsep_im2col_kernel(x_ref, w_ref, b_ref, o_ref, col_ref, *, K):
    """Single wide MXU dot per row tile (small-C path).

    x_ref  : (1, Hp2, Wp, Cp)    padded NHWC image (VMEM-resident)
    w_ref  : (K*K*Cp, Coutp)     fused per-tap weights, tap-major flattened
    b_ref  : (1, Coutp)          fused bias (f32)
    o_ref  : (1, M, Coutp)       one row tile of the flattened (H*W) output
    col_ref: (M, K*K*Cp)         im2col VMEM scratch (x dtype)
    """
    Cp = x_ref.shape[3]
    Wout = x_ref.shape[2] - K + 1
    M = o_ref.shape[1]
    TH = M // Wout
    row0 = pl.multiple_of(pl.program_id(1) * TH, TH)

    # Gather the K*K shifted slabs into a lane-dense im2col buffer.
    for kh in range(K):                      # static unroll (K is small)
        for kw in range(K):
            tap = kh * K + kw
            slab = x_ref[0, pl.ds(row0 + kh, TH), pl.ds(kw, Wout), :]
            col_ref[:, tap * Cp:(tap + 1) * Cp] = slab.reshape(M, Cp)

    # One wide contraction (K*K*Cp) instead of K*K small dots + VALU adds.
    acc = jnp.dot(col_ref[...], w_ref[...], preferred_element_type=jnp.float32)
    o_ref[0] = (acc + b_ref[0, :]).astype(o_ref.dtype)


def _dwsep_pertap_kernel(x_ref, w_ref, b_ref, o_ref, *, K):
    """Fallback for large Cp (contraction already MXU-wide): K*K accumulated dots.

    w_ref : (K, K, Cp, Coutp)
    """
    Cp = x_ref.shape[3]
    Wout = x_ref.shape[2] - K + 1
    M = o_ref.shape[1]
    TH = M // Wout
    row0 = pl.multiple_of(pl.program_id(1) * TH, TH)

    def tap_dot(kh, kw):
        slab = x_ref[0, pl.ds(row0 + kh, TH), pl.ds(kw, Wout), :]
        return jnp.dot(slab.reshape(M, Cp), w_ref[kh, kw],
                       preferred_element_type=jnp.float32)

    acc = tap_dot(0, 0) + b_ref[0, :]       # first tap + bias: no zero fill
    for kh in range(K):
        for kw in range(K):
            if kh == 0 and kw == 0:
                continue
            acc = acc + tap_dot(kh, kw)
    o_ref[0] = acc.astype(o_ref.dtype)


# ---------------------------------------------------------------------------
# Wrapper helpers
# ---------------------------------------------------------------------------
def _vmem_capacity_bytes():
    try:
        info = pltpu.get_tpu_info()
        cap = getattr(info, "vmem_capacity_bytes", None)
        if cap:
            return int(cap)
    except Exception:
        pass
    return 64 * 1024 * 1024          # conservative default (v7x per-TensorCore)


def _pick_row_tile(hout, wout, coutp, col_row_bytes, out_row_bytes,
                   avail_bytes, n_batch, *, max_acc_bytes=128 * 1024,
                   target_m=256):
    """Pick the output-row tile height TH.

    Requirements: (a) flat output block (TH*Wout, Coutp) is (8,128) layout
    legal, (b) f32 result tile fits the vreg budget, (c) im2col scratch +
    double-buffered output tile fit the remaining VMEM, (d) with batch == 1
    prefer >= 2 row tiles so both v7x TensorCores get work.
    """
    def legal(th):
        return (th * wout) % 8 == 0 or pl.cdiv(hout, th) == 1

    cands = [th for th in range(1, hout + 1)
             if legal(th)
             and th * wout * coutp * 4 <= max_acc_bytes
             and th * (col_row_bytes + 2 * out_row_bytes) <= avail_bytes]
    if n_batch == 1:
        split = [th for th in cands if pl.cdiv(hout, th) >= 2]
        if split:
            cands = split
    if not cands:
        return hout                      # single full tile: always layout-legal
    for th in cands:                     # smallest tile that fills the MXU M dim
        if th * wout >= target_m:
            return th
    return cands[-1]


# ---------------------------------------------------------------------------
# Public wrapper
# ---------------------------------------------------------------------------
def depthwise_separable_conv(x_nchw, dw_w, dw_b, pw_w, pw_b, *,
                             padding=0, kernels_per_layer=1,
                             force_per_tap=False):
    """x_nchw: (N, C, H, W); dw_w: (C*kpl, 1, K, K); dw_b: (C*kpl,);
    pw_w: (Cout, C*kpl, 1, 1); pw_b: (Cout,). Returns (N, Cout, Hout, Wout).
    Stride 1 / dilation 1 / symmetric padding only (what the module expresses)."""
    N, C, H, W = x_nchw.shape
    Cm, one, K, K2 = dw_w.shape
    Cout = pw_w.shape[0]
    p = int(padding)
    kpl = int(kernels_per_layer)

    assert K == K2 and one == 1, "depthwise weight must be (C*kpl, 1, K, K)"
    assert Cm == C * kpl, "kernels_per_layer mismatch"
    assert pw_w.shape == (Cout, Cm, 1, 1) and dw_b.shape == (Cm,)
    assert pw_b.shape == (Cout,) and p >= 0

    Hp, Wp = H + 2 * p, W + 2 * p
    Hout, Wout = Hp - K + 1, Wp - K + 1
    assert Hout >= 1 and Wout >= 1

    # ---- fold depthwise into pointwise, in f32 (tiny weight-only work) -----
    dww = jnp.transpose(dw_w[:, 0, :, :], (1, 2, 0)).astype(jnp.float32)  # (K,K,Cm)
    pww = jnp.transpose(pw_w[:, :, 0, 0], (1, 0)).astype(jnp.float32)     # (Cm,Cout)
    w_tap = jnp.einsum('hwcm,cmo->hwco',
                       dww.reshape(K, K, C, kpl),
                       pww.reshape(C, kpl, Cout))                          # (K,K,C,Cout)
    b_eff = pw_b.astype(jnp.float32) + dw_b.astype(jnp.float32) @ pww      # (Cout,)

    # ---- lane-dense operands: pad C and Cout to multiples of 128 ------------
    Cp = pl.cdiv(C, 128) * 128
    Coutp = pl.cdiv(Cout, 128) * 128
    w_tap = jnp.pad(w_tap, ((0, 0), (0, 0), (0, Cp - C), (0, Coutp - Cout)))
    w_tap = w_tap.astype(x_nchw.dtype)          # native MXU dtype, f32 accumulate
    b_eff = jnp.pad(b_eff, (0, Coutp - Cout)).reshape(1, Coutp)

    itemsize = jnp.dtype(x_nchw.dtype).itemsize
    KK = K * K
    use_im2col = (Cp <= 256) and not force_per_tap

    # ---- row-tile selection with a per-chip VMEM budget ---------------------
    cap = _vmem_capacity_bytes()
    img_bytes_est = (Hp + 8) * Wp * Cp * itemsize         # + slack for ragged pad
    w_bytes = KK * Cp * Coutp * itemsize
    avail = max((cap * 85) // 100 - 2 * img_bytes_est - 2 * w_bytes - (4 << 20),
                1 << 20)
    col_row_bytes = Wout * KK * Cp * itemsize if use_im2col else 0
    out_row_bytes = Wout * Coutp * itemsize
    TH = _pick_row_tile(Hout, Wout, Coutp, col_row_bytes, out_row_bytes, avail, N)
    n_tiles = pl.cdiv(Hout, TH)
    Hout_pad = n_tiles * TH
    M = TH * Wout

    # ---- layout glue: NCHW->NHWC + spatial pad + channel pad (one pass) -----
    # TODO(synk): if the surrounding model runs NHWC, drop these transposes —
    # for small C they are a full extra HBM round trip on each side.
    x = jnp.transpose(x_nchw, (0, 2, 3, 1))                 # (N, H, W, C)
    Hp2 = Hout_pad + K - 1                                  # bottom pad for ragged last tile
    x = jnp.pad(x, ((0, 0), (p, Hp2 - H - p), (p, p), (0, Cp - C)))

    # ---- VMEM budget for the compiler ---------------------------------------
    img_bytes = Hp2 * Wp * Cp * itemsize
    col_bytes = M * KK * Cp * itemsize if use_im2col else 0
    out_blk_bytes = M * Coutp * itemsize
    needed = 2 * img_bytes + 2 * w_bytes + 2 * out_blk_bytes + col_bytes + (4 << 20)
    vmem_limit = int(max(32 << 20, min(needed, (cap * 85) // 100)))
    # TODO(synk): very large images keep the whole padded image VMEM-resident;
    # a halo-tiled input window (Element-indexed H dim or manual DMA) is needed
    # to fit v7x's 64 MiB VMEM for multi-MiB images.

    if use_im2col:
        kernel = functools.partial(_dwsep_im2col_kernel, K=K)
        w_pass = w_tap.reshape(KK * Cp, Coutp)
        w_spec = pl.BlockSpec((KK * Cp, Coutp), lambda n, t: (0, 0))
        scratch = [pltpu.VMEM((M, KK * Cp), x.dtype)]
    else:
        kernel = functools.partial(_dwsep_pertap_kernel, K=K)
        w_pass = w_tap
        w_spec = pl.BlockSpec((K, K, Cp, Coutp), lambda n, t: (0, 0, 0, 0))
        scratch = []

    out_flat = pl.pallas_call(
        kernel,
        out_shape=jax.ShapeDtypeStruct((N, Hout_pad * Wout, Coutp), x_nchw.dtype),
        grid=(N, n_tiles),
        in_specs=[
            pl.BlockSpec((1, Hp2, Wp, Cp), lambda n, t: (n, 0, 0, 0)),
            w_spec,
            pl.BlockSpec((1, Coutp), lambda n, t: (0, 0)),
        ],
        out_specs=pl.BlockSpec((1, M, Coutp), lambda n, t: (n, t, 0)),
        scratch_shapes=scratch,
        compiler_params=pltpu.CompilerParams(
            dimension_semantics=("parallel", "parallel"),
            vmem_limit_bytes=vmem_limit),
    )(x, w_pass, b_eff)

    out = out_flat.reshape(N, Hout_pad, Wout, Coutp)[:, :Hout, :, :Cout]
    return jnp.transpose(out, (0, 3, 1, 2))                 # NHWC -> NCHW


# ---------------------------------------------------------------------------
# Pure-JAX reference mirroring the torch module (for the correctness check)
# ---------------------------------------------------------------------------
def _reference(x_nchw, dw_w, dw_b, pw_w, pw_b, *, padding, kernels_per_layer):
    C = x_nchw.shape[1]
    y = lax.conv_general_dilated(
        x_nchw, dw_w, window_strides=(1, 1),
        padding=[(padding, padding), (padding, padding)],
        feature_group_count=C,
        dimension_numbers=("NCHW", "OIHW", "NCHW"))
    y = y + dw_b[None, :, None, None]
    z = lax.conv_general_dilated(
        y, pw_w, window_strides=(1, 1), padding=[(0, 0), (0, 0)],
        dimension_numbers=("NCHW", "OIHW", "NCHW"))
    return z + pw_b[None, :, None, None]


if __name__ == "__main__":
    key = jax.random.PRNGKey(0)
    # (N, C_in, H, W, C_out, K, pad, kernels_per_layer, force_per_tap)
    cases = [
        (2, 4, 16, 16, 8, 3, 1, 1, False),   # primary shape, im2col path
        (2, 4, 16, 16, 8, 3, 1, 2, False),   # channel-multiplier folding
        (2, 4, 16, 16, 8, 3, 1, 1, True),    # per-tap fallback path
        (2, 4, 15, 15, 8, 3, 1, 1, False),   # ragged/odd spatial dims
    ]
    for idx, (N, C_in, H, W, C_out, K, PAD, KPL, FORCE) in enumerate(cases):
        Cm = C_in * KPL
        kx, k1, k2, k3, k4 = jax.random.split(jax.random.fold_in(key, idx), 5)
        x = jax.random.normal(kx, (N, C_in, H, W), jnp.float32)
        dw_w = 0.1 * jax.random.normal(k1, (Cm, 1, K, K), jnp.float32)
        dw_b = 0.1 * jax.random.normal(k2, (Cm,), jnp.float32)
        pw_w = 0.1 * jax.random.normal(k3, (C_out, Cm, 1, 1), jnp.float32)
        pw_b = 0.1 * jax.random.normal(k4, (C_out,), jnp.float32)

        out = depthwise_separable_conv(x, dw_w, dw_b, pw_w, pw_b,
                                       padding=PAD, kernels_per_layer=KPL,
                                       force_per_tap=FORCE)
        out = jax.block_until_ready(out)

        ref = _reference(x, dw_w, dw_b, pw_w, pw_b,
                         padding=PAD, kernels_per_layer=KPL)
        Hout = H + 2 * PAD - K + 1
        Wout = W + 2 * PAD - K + 1
        assert out.shape == (N, C_out, Hout, Wout), out.shape
        err = float(jnp.max(jnp.abs(out - ref)))
        assert err < 1e-4, f"case {idx}: max abs err {err}"

    print("KERNEL_OK")
</pallas_src>

<mosaic_0001>
module attributes {stable_mosaic.version = 11 : i64} {
  func.func @_dwsep_im2col_kernel(%arg0: i32, %arg1: i32, %arg2: memref<1x18x18x128xf32, #tpu.memory_space<vmem>>, %arg3: memref<1152x128xf32, #tpu.memory_space<vmem>>, %arg4: memref<1x128xf32, #tpu.memory_space<vmem>>, %arg5: memref<1x256x128xf32, #tpu.memory_space<vmem>>, %arg6: memref<256x1152xf32, #tpu.memory_space<vmem>>) attributes {dimension_semantics = [#tpu.dimension_semantics<parallel>, #tpu.dimension_semantics<parallel>], iteration_bounds = array<i64: 2, 1>, scalar_prefetch = 0 : i64, scratch_operands = 1 : i64, tpu.core_type = #tpu.core_type<tc>, window_params = [{transform_indices = @transform_0, window_bounds = array<i64: 1, 18, 18, 128>}, {pipeline_mode = #tpu.pipeline_mode<synchronous>, transform_indices = @transform_1, window_bounds = array<i64: 1152, 128>}, {pipeline_mode = #tpu.pipeline_mode<synchronous>, transform_indices = @transform_2, window_bounds = array<i64: 1, 128>}, {transform_indices = @transform_3, window_bounds = array<i64: 1, 256, 128>}]} {
    %c16_i32 = arith.constant 16 : i32
    %0 = arith.muli %arg1, %c16_i32 : i32
    %1 = tpu.assume_multiple %0, 16 : i32
    %c0_i32 = arith.constant 0 : i32
    %2 = arith.addi %1, %c0_i32 : i32
    %c0 = arith.constant 0 : index
    %3 = arith.index_cast %2 : i32 to index
    %c0_0 = arith.constant 0 : index
    %c0_1 = arith.constant 0 : index
    %4 = vector.load %arg2[%c0, %3, %c0_0, %c0_1] : memref<1x18x18x128xf32, #tpu.memory_space<vmem>>, vector<1x16x16x128xf32>
    %5 = vector.shape_cast %4 : vector<1x16x16x128xf32> to vector<16x16x128xf32>
    %6 = vector.shape_cast %5 : vector<16x16x128xf32> to vector<256x128xf32>
    %c0_2 = arith.constant 0 : index
    %c0_3 = arith.constant 0 : index
    %7 = vector.load %arg6[%c0_2, %c0_3] : memref<256x1152xf32, #tpu.memory_space<vmem>>, vector<256x128xf32>
    tpu.vector_store %arg6[%c0_2, %c0_3], %6 {strides = array<i32>} : memref<256x1152xf32, #tpu.memory_space<vmem>>, vector<256x128xf32>,
    %c0_i32_4 = arith.constant 0 : i32
    %8 = arith.addi %1, %c0_i32_4 : i32
    %c0_5 = arith.constant 0 : index
    %9 = arith.index_cast %8 : i32 to index
    %c1 = arith.constant 1 : index
    %c0_6 = arith.constant 0 : index
    %10 = vector.load %arg2[%c0_5, %9, %c1, %c0_6] : memref<1x18x18x128xf32, #tpu.memory_space<vmem>>, vector<1x16x16x128xf32>
    %11 = vector.shape_cast %10 : vector<1x16x16x128xf32> to vector<16x16x128xf32>
    %12 = vector.shape_cast %11 : vector<16x16x128xf32> to vector<256x128xf32>
    %c0_7 = arith.constant 0 : index
    %c128 = arith.constant 128 : index
    %13 = vector.load %arg6[%c0_7, %c128] : memref<256x1152xf32, #tpu.memory_space<vmem>>, vector<256x128xf32>
    tpu.vector_store %arg6[%c0_7, %c128], %12 {strides = array<i32>} : memref<256x1152xf32, #tpu.memory_space<vmem>>, vector<256x128xf32>,
    %c0_i32_8 = arith.constant 0 : i32
    %14 = arith.addi %1, %c0_i32_8 : i32
    %c0_9 = arith.constant 0 : index
    %15 = arith.index_cast %14 : i32 to index
    %c2 = arith.constant 2 : index
    %c0_10 = arith.constant 0 : index
    %16 = vector.load %arg2[%c0_9, %15, %c2, %c0_10] : memref<1x18x18x128xf32, #tpu.memory_space<vmem>>, vector<1x16x16x128xf32>
    %17 = vector.shape_cast %16 : vector<1x16x16x128xf32> to vector<16x16x128xf32>
    %18 = vector.shape_cast %17 : vector<16x16x128xf32> to vector<256x128xf32>
    %c0_11 = arith.constant 0 : index
    %c256 = arith.constant 256 : index
    %19 = vector.load %arg6[%c0_11, %c256] : memref<256x1152xf32, #tpu.memory_space<vmem>>, vector<256x128xf32>
    tpu.vector_store %arg6[%c0_11, %c256], %18 {strides = array<i32>} : memref<256x1152xf32, #tpu.memory_space<vmem>>, vector<256x128xf32>,
    %c1_i32 = arith.constant 1 : i32
    %20 = arith.addi %1, %c1_i32 : i32
    %c0_12 = arith.constant 0 : index
    %21 = arith.index_cast %20 : i32 to index
    %c0_13 = arith.constant 0 : index
    %c0_14 = arith.constant 0 : index
    %22 = vector.load %arg2[%c0_12, %21, %c0_13, %c0_14] : memref<1x18x18x128xf32, #tpu.memory_space<vmem>>, vector<1x16x16x128xf32>
    %23 = vector.shape_cast %22 : vector<1x16x16x128xf32> to vector<16x16x128xf32>
    %24 = vector.shape_cast %23 : vector<16x16x128xf32> to vector<256x128xf32>
    %c0_15 = arith.constant 0 : index
    %c384 = arith.constant 384 : index
    %25 = vector.load %arg6[%c0_15, %c384] : memref<256x1152xf32, #tpu.memory_space<vmem>>, vector<256x128xf32>
    tpu.vector_store %arg6[%c0_15, %c384], %24 {strides = array<i32>} : memref<256x1152xf32, #tpu.memory_space<vmem>>, vector<256x128xf32>,
    %c1_i32_16 = arith.constant 1 : i32
    %26 = arith.addi %1, %c1_i32_16 : i32
    %c0_17 = arith.constant 0 : index
    %27 = arith.index_cast %26 : i32 to index
    %c1_18 = arith.constant 1 : index
    %c0_19 = arith.constant 0 : index
    %28 = vector.load %arg2[%c0_17, %27, %c1_18, %c0_19] : memref<1x18x18x128xf32, #tpu.memory_space<vmem>>, vector<1x16x16x128xf32>
    %29 = vector.shape_cast %28 : vector<1x16x16x128xf32> to vector<16x16x128xf32>
    %30 = vector.shape_cast %29 : vector<16x16x128xf32> to vector<256x128xf32>
    %c0_20 = arith.constant 0 : index
    %c512 = arith.constant 512 : index
    %31 = vector.load %arg6[%c0_20, %c512] : memref<256x1152xf32, #tpu.memory_space<vmem>>, vector<256x128xf32>
    tpu.vector_store %arg6[%c0_20, %c512], %30 {strides = array<i32>} : memref<256x1152xf32, #tpu.memory_space<vmem>>, vector<256x128xf32>,
    %c1_i32_21 = arith.constant 1 : i32
    %32 = arith.addi %1, %c1_i32_21 : i32
    %c0_22 = arith.constant 0 : index
    %33 = arith.index_cast %32 : i32 to index
    %c2_23 = arith.constant 2 : index
    %c0_24 = arith.constant 0 : index
    %34 = vector.load %arg2[%c0_22, %33, %c2_23, %c0_24] : memref<1x18x18x128xf32, #tpu.memory_space<vmem>>, vector<1x16x16x128xf32>
    %35 = vector.shape_cast %34 : vector<1x16x16x128xf32> to vector<16x16x128xf32>
    %36 = vector.shape_cast %35 : vector<16x16x128xf32> to vector<256x128xf32>
    %c0_25 = arith.constant 0 : index
    %c640 = arith.constant 640 : index
    %37 = vector.load %arg6[%c0_25, %c640] : memref<256x1152xf32, #tpu.memory_space<vmem>>, vector<256x128xf32>
    tpu.vector_store %arg6[%c0_25, %c640], %36 {strides = array<i32>} : memref<256x1152xf32, #tpu.memory_space<vmem>>, vector<256x128xf32>,
    %c2_i32 = arith.constant 2 : i32
    %38 = arith.addi %1, %c2_i32 : i32
    %c0_26 = arith.constant 0 : index
    %39 = arith.index_cast %38 : i32 to index
    %c0_27 = arith.constant 0 : index
    %c0_28 = arith.constant 0 : index
    %40 = vector.load %arg2[%c0_26, %39, %c0_27, %c0_28] : memref<1x18x18x128xf32, #tpu.memory_space<vmem>>, vector<1x16x16x128xf32>
    %41 = vector.shape_cast %40 : vector<1x16x16x128xf32> to vector<16x16x128xf32>
    %42 = vector.shape_cast %41 : vector<16x16x128xf32> to vector<256x128xf32>
    %c0_29 = arith.constant 0 : index
    %c768 = arith.constant 768 : index
    %43 = vector.load %arg6[%c0_29, %c768] : memref<256x1152xf32, #tpu.memory_space<vmem>>, vector<256x128xf32>
    tpu.vector_store %arg6[%c0_29, %c768], %42 {strides = array<i32>} : memref<256x1152xf32, #tpu.memory_space<vmem>>, vector<256x128xf32>,
    %c2_i32_30 = arith.constant 2 : i32
    %44 = arith.addi %1, %c2_i32_30 : i32
    %c0_31 = arith.constant 0 : index
    %45 = arith.index_cast %44 : i32 to index
    %c1_32 = arith.constant 1 : index
    %c0_33 = arith.constant 0 : index
    %46 = vector.load %arg2[%c0_31, %45, %c1_32, %c0_33] : memref<1x18x18x128xf32, #tpu.memory_space<vmem>>, vector<1x16x16x128xf32>
    %47 = vector.shape_cast %46 : vector<1x16x16x128xf32> to vector<16x16x128xf32>
    %48 = vector.shape_cast %47 : vector<16x16x128xf32> to vector<256x128xf32>
    %c0_34 = arith.constant 0 : index
    %c896 = arith.constant 896 : index
    %49 = vector.load %arg6[%c0_34, %c896] : memref<256x1152xf32, #tpu.memory_space<vmem>>, vector<256x128xf32>
    tpu.vector_store %arg6[%c0_34, %c896], %48 {strides = array<i32>} : memref<256x1152xf32, #tpu.memory_space<vmem>>, vector<256x128xf32>,
    %c2_i32_35 = arith.constant 2 : i32
    %50 = arith.addi %1, %c2_i32_35 : i32
    %c0_36 = arith.constant 0 : index
    %51 = arith.index_cast %50 : i32 to index
    %c2_37 = arith.constant 2 : index
    %c0_38 = arith.constant 0 : index
    %52 = vector.load %arg2[%c0_36, %51, %c2_37, %c0_38] : memref<1x18x18x128xf32, #tpu.memory_space<vmem>>, vector<1x16x16x128xf32>
    %53 = vector.shape_cast %52 : vector<1x16x16x128xf32> to vector<16x16x128xf32>
    %54 = vector.shape_cast %53 : vector<16x16x128xf32> to vector<256x128xf32>
    %c0_39 = arith.constant 0 : index
    %c1024 = arith.constant 1024 : index
    %55 = vector.load %arg6[%c0_39, %c1024] : memref<256x1152xf32, #tpu.memory_space<vmem>>, vector<256x128xf32>
    tpu.vector_store %arg6[%c0_39, %c1024], %54 {strides = array<i32>} : memref<256x1152xf32, #tpu.memory_space<vmem>>, vector<256x128xf32>,
    %c0_40 = arith.constant 0 : index
    %c0_41 = arith.constant 0 : index
    %56 = vector.load %arg6[%c0_40, %c0_41] : memref<256x1152xf32, #tpu.memory_space<vmem>>, vector<256x1152xf32>
    %c0_42 = arith.constant 0 : index
    %c0_43 = arith.constant 0 : index
    %57 = vector.load %arg3[%c0_42, %c0_43] : memref<1152x128xf32, #tpu.memory_space<vmem>>, vector<1152x128xf32>
    %cst = arith.constant dense<0.000000e+00> : vector<256x128xf32>
    %58 = tpu.matmul %56, %57, %cst {dimension_numbers = #tpu.dot_dimension_numbers<[1], [0], [0], [1], [0, 0, 1, 1], [], []>} : vector<256x1152xf32>, vector<1152x128xf32>, vector<256x128xf32> -> vector<256x128xf32>
    %c0_44 = arith.constant 0 : index
    %c0_45 = arith.constant 0 : index
    %59 = vector.load %arg4[%c0_44, %c0_45] : memref<1x128xf32, #tpu.memory_space<vmem>>, vector<1x128xf32>
    %60 = vector.shape_cast %59 : vector<1x128xf32> to vector<128xf32>
    %61 = vector.shape_cast %60 : vector<128xf32> to vector<1x128xf32>
    %62 = vector.broadcast %61 : vector<1x128xf32> to vector<256x128xf32>
    %63 = arith.addf %58, %62 : vector<256x128xf32>
    %c0_46 = arith.constant 0 : index
    %c0_47 = arith.constant 0 : index
    %c0_48 = arith.constant 0 : index
    %64 = vector.load %arg5[%c0_46, %c0_47, %c0_48] : memref<1x256x128xf32, #tpu.memory_space<vmem>>, vector<1x256x128xf32>
    %65 = vector.shape_cast %64 : vector<1x256x128xf32> to vector<256x128xf32>
    %66 = vector.shape_cast %63 : vector<256x128xf32> to vector<1x256x128xf32>
    tpu.vector_store %arg5[%c0_46, %c0_47, %c0_48], %66 {strides = array<i32>} : memref<1x256x128xf32, #tpu.memory_space<vmem>>, vector<1x256x128xf32>,
    return
  }
  func.func @transform_0(%arg0: i32, %arg1: i32) -> (i32, i32, i32, i32) {
    %c0_i32 = arith.constant 0 : i32
    %c0_i32_0 = arith.constant 0 : i32
    %c0_i32_1 = arith.constant 0 : i32
    %c0_i32_2 = arith.constant 0 : i32
    return %arg0, %c0_i32, %c0_i32_0, %c0_i32_1 : i32, i32, i32, i32
  }
  func.func @transform_1(%arg0: i32, %arg1: i32) -> (i32, i32) {
    %c0_i32 = arith.constant 0 : i32
    %c0_i32_0 = arith.constant 0 : i32
    %c0_i32_1 = arith.constant 0 : i32
    return %c0_i32, %c0_i32_0 : i32, i32
  }
  func.func @transform_2(%arg0: i32, %arg1: i32) -> (i32, i32) {
    %c0_i32 = arith.constant 0 : i32
    %c0_i32_0 = arith.constant 0 : i32
    %c0_i32_1 = arith.constant 0 : i32
    return %c0_i32, %c0_i32_0 : i32, i32
  }
  func.func @transform_3(%arg0: i32, %arg1: i32) -> (i32, i32, i32) {
    %c0_i32 = arith.constant 0 : i32
    %c0_i32_0 = arith.constant 0 : i32
    return %arg0, %arg1, %c0_i32 : i32, i32, i32
  }
}

</mosaic_0001>

<bundles_post_ra>
// kernel: tpu_custom_call.1
= control target key start
LH: loop header
LB: loop body
LE: loop exit
PB: predicated region body
PF: predicated region fallthrough
CT: control target
= control target key end

     0   :  { %8 = vsyncpa [#allocation4], 0  ;;  %s4938_s0 = inlined_call_operand.vmem [shape: f32[2,18,18,128], index: 0, kind: input, shape index: {}]   ;;  %s4939_s1 = inlined_call_operand.vmem [shape: f32[1152,128], index: 1, kind: input, shape index: {}]   ;;  %s4940_s2 = inlined_call_operand.vmem [shape: f32[1,128], index: 2, kind: input, shape index: {}]   ;;  %s4941_s3 = inlined_call_operand.hbm [shape: f32[2,256,128], index: 3, kind: output, shape index: {}]  }
   0x1   :  { %10 = vsyncpa [#allocation4 + $0x1], 0  ;;  %s3385_s12 = smov 0   ;;  %s3387_s13 = smov 0  }
   0x2   :  { %s3389_s14 = smov 0   ;;  %s3391_s15 = smov 0  }
   0x3   :  { %s3393_s16 = smov 0   ;;  %s3395_s17 = smov 0  }
   0x4 LB: > { %s2464_s18 = sadd.s32 4294967295, %s3359_s17   ;;  %s2465_s19 = sadd.s32 4294967294, %s3359_s17   ;;  %s3359_s17 = sphi %s3395_s17, %s16_s17   ;;  %s3355_s16 = sphi %s3393_s16, %s5088_s16   ;;  %s3351_s15 = sphi %s3391_s15, %s5087_s15   ;;  %s3347_s14 = sphi %s3389_s14, %s5086_s14   ;;  %s3343_s13 = sphi %s3387_s13, %s5085_s13   ;;  %s3339_s12 = sphi %s3385_s12, %s5084_s12  }
   0x5   : > { %s28_s20 = sadd.s32 1, %s3355_s16  ;;  %s105_s21 = sadd.s32 1, %s3347_s14 }
   0x6   : > { %p30_p0 = scmp.ge.s32.totalorder %s28_s20, 2  ;;  %p115_p1 = scmp.ne.s32.totalorder %s3347_s14, %s3343_s13 }
   0x7   : > { %p116_p2 = scmp.eq.s32.totalorder %s2464_s18, 1  ;;  %p121_p3 = scmp.ne.s32.totalorder %s3343_s13, %s3339_s12 }
   0x8   : > { %s5090_s20 = smov (%p30_p0, %s28_s20), 0  ;;  %p122_p5 = scmp.eq.s32.totalorder %s2465_s19, 1 }
   0x9   : > { %p3425_p4 = por %p116_p2, %p115_p1  ;;  %s100_s23 = ssub.s32 %s3355_s16, %s5090_s20 }
   0xa   : > { %p2468_p6 = scmp.ge.s32.totalorder %s3359_s17, 1  ;;  %p103_p7 = scmp.eq.s32.totalorder %s100_s23, 0 }
   0xb   : > { %p3432_p8 = por %p122_p5, %p121_p3  ;;  %p154_p9 = scmp.lt.s32.totalorder %s3359_s17, 3 }
   0xc   : > { %s3438_s25 = scalar_select %p103_p7, %s3347_s14, %s105_s21  }
   0xd   : > { %p155_p10 = pnand %p2468_p6, %p154_p9 }
   0xf   : > { %158 = sbr.rel (%p155_p10) target bundleno = 604 (0x25c), region = 32 }
  0x16   : > { %v1057_v0 = vld [vmem:[%s4939_s1] sm:$0xff]  ;;  %v1058_v1 = vld [vmem:[%s4939_s1 + $0x8] sm:$0xff]  ;;  %v4942_v3 = vmov 0.0|0.0   ;;  %v1059_v6 = vld [vmem:[%s4939_s1 + $0x10] sm:$0xff]  ;;  %p178_p11 = scmp.lt.s32.totalorder %s3351_s15, 1  ;;  %s175_s29 = sand.u32 1, %s3343_s13  }
  0x17   : > { %v1089_v2 = vld [vmem:[%s4939_s1 + $0x100] sm:$0xff]  ;;  %2798 = vmatprep.subr.bf16.mxu1 %v4942_v3  ;;  %2846 = vmatprep.subr.bf16.mxu0 %v4942_v3  ;;  %v2799_v4 = vpack.c.bf16 %v1058_v1, %v1057_v0  ;;  %v1090_v5 = vld [vmem:[%s4939_s1 + $0x108] sm:$0xff]  ;;  %v1060_v7 = vld [vmem:[%s4939_s1 + $0x18] sm:$0xff]  ;;  %s2469_s30 = sshll.u32 %s175_s29, 8  ;;  %s2669_s5 = sshll.u32 %s3351_s15, 12 }
  0x18   : > { %v2847_v8 = vpack.c.bf16 %v1090_v5, %v1089_v2  ;;  %v1091_v9 = vld [vmem:[%s4939_s1 + $0x110] sm:$0xff]  ;;  %v1092_v10 = vld [vmem:[%s4939_s1 + $0x118] sm:$0xff]  ;;  %v2802_v11 = vpack.c.bf16 %v1060_v7, %v1059_v6  ;;  %v1061_v13 = vld [vmem:[%s4939_s1 + $0x20] sm:$0xff]  ;;  %s179_s21 = scalar_select %p178_p11, %s3351_s15, 1 }
  0x19   : > { %2800 = vmatpush1.bf16.msra.mxu1 %v2799_v4  ;;  %v2850_v12 = vpack.c.bf16 %v1092_v10, %v1091_v9  ;;  %v1062_v14 = vld [vmem:[%s4939_s1 + $0x28] sm:$0xff]  ;;  %v1093_v15 = vld [vmem:[%s4939_s1 + $0x120] sm:$0xff]  ;;  %v1063_v19 = vld [vmem:[%s4939_s1 + $0x30] sm:$0xff]  ;;  %s4783_s4 = scalar_lea.vmem [#allocation3], %s2469_s30  ;;  %s4883_s9 = scalar_lea.hbm %s4941_s3, %s2669_s5 }
  0x1a   : > { %2848 = vmatpush1.bf16.msra.mxu0 %v2847_v8  ;;  %2801 = vmatprep.subr.bf16.mxu1 %v4942_v3  ;;  %v1094_v16 = vld [vmem:[%s4939_s1 + $0x128] sm:$0xff]  ;;  %v2805_v17 = vpack.c.bf16 %v1062_v14, %v1061_v13  ;;  %v1064_v20 = vld [vmem:[%s4939_s1 + $0x38] sm:$0xff]  ;;  %v1095_v21 = vld [vmem:[%s4939_s1 + $0x130] sm:$0xff]  ;;  %s3222_s6 = smul.u32 432, %s179_s21  ;;  %s2381_s7 = sshll.u32 %s4783_s4, 4  ;;  %s4885_s7 = int_to_ptr.vmem [resolvable:$true] %s2381_s7 }
  0x1b   : > { %2849 = vmatprep.subr.bf16.mxu0 %v4942_v3  ;;  %v2853_v18 = vpack.c.bf16 %v1094_v16, %v1093_v15  ;;  %v1096_v22 = vld [vmem:[%s4939_s1 + $0x138] sm:$0xff]  ;;  %v2808_v23 = vpack.c.bf16 %v1064_v20, %v1063_v19  ;;  %v1065_v25 = vld [vmem:[%s4939_s1 + $0x40] sm:$0xff]  ;;  %v1066_v26 = vld [vmem:[%s4939_s1 + $0x48] sm:$0xff]  ;;  %s4892_s15 = scalar_lea.sflag [#allocation4], %s175_s29  ;;  %s3281_s10 = scalar_lea.vmem %s4885_s7, 4096 }
  0x1c   : > { %v2856_v24 = vpack.c.bf16 %v1096_v22, %v1095_v21  ;;  %v1097_v27 = vld [vmem:[%s4939_s1 + $0x140] sm:$0xff]  ;;  %v1098_v28 = vld [vmem:[%s4939_s1 + $0x148] sm:$0xff]  ;;  %v2811_v29 = vpack.c.bf16 %v1066_v26, %v1065_v25  ;;  %v1067_v31 = vld [vmem:[%s4939_s1 + $0x50] sm:$0xff]  ;;  %s3527_s27 = scalar_lea.vmem %s4938_s0, %s3222_s6  ;;  %p3282_p12 = scmp.ne.s32.totalorder %s4885_s7, %s3281_s10 }
  0x1d   : > { %2803 = vmatpush1.bf16.msra.mxu1 %v2802_v11  ;;  %v2859_v30 = vpack.c.bf16 %v1098_v28, %v1097_v27  ;;  %v1068_v32 = vld [vmem:[%s4939_s1 + $0x58] sm:$0xff]  ;;  %v1099_v33 = vld [vmem:[%s4939_s1 + $0x150] sm:$0xff]  ;;  %v1069_v37 = vld [vmem:[%s4939_s1 + $0x60] sm:$0xff]  ;;  %s3362_s11 = smov [#allocation3]  }
  0x1e   : > { %2851 = vmatpush1.bf16.msra.mxu0 %v2850_v12  ;;  %2804 = vmatprep.subr.bf16.mxu1 %v4942_v3  ;;  %v1100_v34 = vld [vmem:[%s4939_s1 + $0x158] sm:$0xff]  ;;  %v2814_v35 = vpack.c.bf16 %v1068_v32, %v1067_v31  ;;  %v1070_v38 = vld [vmem:[%s4939_s1 + $0x68] sm:$0xff]  ;;  %v1101_v39 = vld [vmem:[%s4939_s1 + $0x160] sm:$0xff]  ;;  %p3283_p13 = pnand %p3282_p12, %p3425_p4  ;;  %s3285_s18 = sshll.u32 %s3362_s11, 4  ;;  %s3286_s18 = int_to_ptr.vmem [resolvable:$false] %s3285_s18 }
  0x1f   : > { %2852 = vmatprep.subr.bf16.mxu0 %v4942_v3  ;;  %v2862_v36 = vpack.c.bf16 %v1100_v34, %v1099_v33  ;;  %v1102_v40 = vld [vmem:[%s4939_s1 + $0x168] sm:$0xff]  ;;  %v3545_v42 = vld [vmem:[%s3527_s27 + $0x18] sm:$0xff]  ;;  %v2817_v43 = vpack.c.bf16 %v1070_v38, %v1069_v37  ;;  %v1071_v45 = vld [vmem:[%s4939_s1 + $0x70] sm:$0xff]  ;;  %s3287_s19 = scalar_lea.vmem %s3286_s18, 8192  ;;  %p3288_p1 = scmp.lt.s32.totalorder %s4885_s7, %s3286_s18 }
  0x20   : > { %v251_v41 = vld [vmem:[%s3527_s27 + $0x1] sm:$0xff]  ;;  %1497 = vmatprep.mubr.f32.mxu0 %v3545_v42  ;;  %v2865_v44 = vpack.c.bf16 %v1102_v40, %v1101_v39  ;;  %v1072_v46 = vld [vmem:[%s4939_s1 + $0x78] sm:$0xff]  ;;  %v1103_v47 = vld [vmem:[%s4939_s1 + $0x170] sm:$0xff]  ;;  %p3284_p0 = pneg %p3283_p13  ;;  %p3289_p2 = scmp.lt.s32.totalorder %s3287_s19, %s3281_s10 }
  0x21   : > { %2806 = vmatpush1.bf16.msra.mxu1 %v2805_v17  ;;  %1272 = vmatprep.mubr.f32.mxu1 %v251_v41  ;;  %v1104_v48 = vld [vmem:[%s4939_s1 + $0x178] sm:$0xff]  ;;  %v2820_v49 = vpack.c.bf16 %v1072_v46, %v1071_v45  ;;  %v1073_v51 = vld [vmem:[%s4939_s1 + $0x80] sm:$0xff]  ;;  %v1074_v52 = vld [vmem:[%s4939_s1 + $0x88] sm:$0xff] }
  0x22   : > { %2854 = vmatpush1.bf16.msra.mxu0 %v2853_v18  ;;  %2807 = vmatprep.subr.bf16.mxu1 %v4942_v3  ;;  %v2868_v50 = vpack.c.bf16 %v1104_v48, %v1103_v47  ;;  %v1105_v53 = vld [vmem:[%s4939_s1 + $0x180] sm:$0xff]  ;;  %v1106_v54 = vld [vmem:[%s4939_s1 + $0x188] sm:$0xff]  ;;  %v2823_v55 = vpack.c.bf16 %v1074_v52, %v1073_v51  ;;  %v1075_v57 = vld [vmem:[%s4939_s1 + $0x90] sm:$0xff]  ;;  %p3290_p3 = por %p3289_p2, %p3288_p1 }
  0x23   : > { %2855 = vmatprep.subr.bf16.mxu0 %v4942_v3  ;;  %v2871_v56 = vpack.c.bf16 %v1106_v54, %v1105_v53  ;;  %v1076_v58 = vld [vmem:[%s4939_s1 + $0x98] sm:$0xff]  ;;  %v1107_v59 = vld [vmem:[%s4939_s1 + $0x190] sm:$0xff]  ;;  %v1077_v63 = vld [vmem:[%s4939_s1 + $0xa0] sm:$0xff] }
  0x24   : > { %v1108_v60 = vld [vmem:[%s4939_s1 + $0x198] sm:$0xff]  ;;  %v2826_v61 = vpack.c.bf16 %v1076_v58, %v1075_v57  ;;  %v1078_v0 = vld [vmem:[%s4939_s1 + $0xa8] sm:$0xff]  ;;  %v1109_v1 = vld [vmem:[%s4939_s1 + $0x1a0] sm:$0xff]  ;;  %p3291_p5 = pnand %p3290_p3, %p3284_p0 }
  0x25   : > { %2809 = vmatpush1.bf16.msra.mxu1 %v2808_v23  ;;  %v2874_v62 = vpack.c.bf16 %v1108_v60, %v1107_v59  ;;  %v1110_v2 = vld [vmem:[%s4939_s1 + $0x1a8] sm:$0xff]  ;;  %v2829_v4 = vpack.c.bf16 %v1078_v0, %v1077_v63  ;;  %v1079_v6 = vld [vmem:[%s4939_s1 + $0xb0] sm:$0xff]  ;;  %v1080_v7 = vld [vmem:[%s4939_s1 + $0xb8] sm:$0xff] }
  0x26   : > { %2857 = vmatpush1.bf16.msra.mxu0 %v2856_v24  ;;  %2810 = vmatprep.subr.bf16.mxu1 %v4942_v3  ;;  %v2877_v5 = vpack.c.bf16 %v1110_v2, %v1109_v1  ;;  %v1111_v8 = vld [vmem:[%s4939_s1 + $0x1b0] sm:$0xff]  ;;  %v1112_v9 = vld [vmem:[%s4939_s1 + $0x1b8] sm:$0xff]  ;;  %v2832_v10 = vpack.c.bf16 %v1080_v7, %v1079_v6  ;;  %v1081_v12 = vld [vmem:[%s4939_s1 + $0xc0] sm:$0xff] }
  0x27   : > { %2858 = vmatprep.subr.bf16.mxu0 %v4942_v3  ;;  %v2880_v11 = vpack.c.bf16 %v1112_v9, %v1111_v8  ;;  %v1082_v13 = vld [vmem:[%s4939_s1 + $0xc8] sm:$0xff]  ;;  %v1113_v14 = vld [vmem:[%s4939_s1 + $0x1c0] sm:$0xff]  ;;  %v1083_v18 = vld [vmem:[%s4939_s1 + $0xd0] sm:$0xff] }
  0x28   : > { %v1114_v15 = vld [vmem:[%s4939_s1 + $0x1c8] sm:$0xff]  ;;  %v2835_v16 = vpack.c.bf16 %v1082_v13, %v1081_v12  ;;  %v1084_v19 = vld [vmem:[%s4939_s1 + $0xd8] sm:$0xff]  ;;  %v1115_v20 = vld [vmem:[%s4939_s1 + $0x1d0] sm:$0xff] }
  0x29   : > { %2812 = vmatpush1.bf16.msra.mxu1 %v2811_v29  ;;  %v2883_v17 = vpack.c.bf16 %v1114_v15, %v1113_v14  ;;  %v1116_v21 = vld [vmem:[%s4939_s1 + $0x1d8] sm:$0xff]  ;;  %v2838_v22 = vpack.c.bf16 %v1084_v19, %v1083_v18  ;;  %v1085_v24 = vld [vmem:[%s4939_s1 + $0xe0] sm:$0xff]  ;;  %v1086_v25 = vld [vmem:[%s4939_s1 + $0xe8] sm:$0xff] }
  0x2a   : > { %2860 = vmatpush1.bf16.msra.mxu0 %v2859_v30  ;;  %2813 = vmatprep.subr.bf16.mxu1 %v4942_v3  ;;  %v2886_v23 = vpack.c.bf16 %v1116_v21, %v1115_v20  ;;  %v1117_v26 = vld [vmem:[%s4939_s1 + $0x1e0] sm:$0xff]  ;;  %v1118_v27 = vld [vmem:[%s4939_s1 + $0x1e8] sm:$0xff]  ;;  %v2841_v28 = vpack.c.bf16 %v1086_v25, %v1085_v24  ;;  %v1087_v30 = vld [vmem:[%s4939_s1 + $0xf0] sm:$0xff] }
  0x2b   : > { %2861 = vmatprep.subr.bf16.mxu0 %v4942_v3  ;;  %v2889_v29 = vpack.c.bf16 %v1118_v27, %v1117_v26  ;;  %v1088_v31 = vld [vmem:[%s4939_s1 + $0xf8] sm:$0xff]  ;;  %v1119_v32 = vld [vmem:[%s4939_s1 + $0x1f0] sm:$0xff]  ;;  %v1154_v37 = vld [vmem:[%s4939_s1 + $0x308] sm:$0xff] }
  0x2c   : > { %v1120_v33 = vld [vmem:[%s4939_s1 + $0x1f8] sm:$0xff]  ;;  %v2844_v34 = vpack.c.bf16 %v1088_v31, %v1087_v30  ;;  %v1121_v38 = vld [vmem:[%s4939_s1 + $0x200] sm:$0xff]  ;;  %v1122_v39 = vld [vmem:[%s4939_s1 + $0x208] sm:$0xff] }
  0x2d   : > { %2815 = vmatpush1.bf16.msra.mxu1 %v2814_v35  ;;  %v2892_v35 = vpack.c.bf16 %v1120_v33, %v1119_v32  ;;  %v187_v40 = vld [vmem:[%s3527_s27] sm:$0xff]  ;;  %v252_v45 = vld [vmem:[%s3527_s27 + $0x9] sm:$0xff]  ;;  %v1124_v47 = vld [vmem:[%s4939_s1 + $0x218] sm:$0xff] }
  0x2e   : > { %2863 = vmatpush1.bf16.msra.mxu0 %v2862_v36  ;;  %2816 = vmatprep.subr.bf16.mxu1 %v4942_v3  ;;  %v1153_v36 = vld [vmem:[%s4939_s1 + $0x300] sm:$0xff]  ;;  %v1123_v46 = vld [vmem:[%s4939_s1 + $0x210] sm:$0xff]  ;;  %v188_v51 = vld [vmem:[%s3527_s27 + $0x8] sm:$0xff] }
  0x2f   : > { %2864 = vmatprep.subr.bf16.mxu0 %v4942_v3  ;;  %v3689_v41 = vpack.c.bf16 %v1154_v37, %v1153_v36  ;;  %v2472_v48 = vld [vmem:[%s3527_s27 + $0x20] sm:$0xff]  ;;  %v316_v52 = vld [vmem:[%s3527_s27 + $0xa] sm:$0xff]  ;;  %v2898_v54 = vpack.c.bf16 %v1124_v47, %v1123_v46  ;;  %v2474_v0 = vld [vmem:[%s3527_s27 + $0x38] sm:$0xff] }
  0x30   : > { %v3712_v53 = vld [vmem:[%s3527_s27 + $0x19] sm:$0xff]  ;;  %v1126_v58 = vld [vmem:[%s4939_s1 + $0x228] sm:$0xff]  ;;  %v1127_v2 = vld [vmem:[%s4939_s1 + $0x230] sm:$0xff] }
  0x31   : > { %2818 = vmatpush1.bf16.msra.mxu1 %v2817_v43  ;;  %v315_v43 = vld [vmem:[%s3527_s27 + $0x2] sm:$0xff]  ;;  %v1160_v6 = vld [vmem:[%s4939_s1 + $0x338] sm:$0xff]  ;;  %v2476_v18 = vld [vmem:[%s3527_s27 + $0x50] sm:$0xff] }
  0x32   : > { %2866 = vmatpush1.bf16.msra.mxu0 %v2865_v44  ;;  %2819 = vmatprep.subr.bf16.mxu1 %v4942_v3  ;;  %v2895_v44 = vpack.c.bf16 %v1122_v39, %v1121_v38  ;;  %v1125_v57 = vld [vmem:[%s4939_s1 + $0x220] sm:$0xff]  ;;  %v1158_v60 = vld [vmem:[%s4939_s1 + $0x328] sm:$0xff]  ;;  %v3763_v8 = vld [vmem:[%s3527_s27 + $0x31] sm:$0xff] }
  0x33   : > { %2867 = vmatprep.subr.bf16.mxu0 %v4942_v3  ;;  %v1157_v59 = vld [vmem:[%s4939_s1 + $0x320] sm:$0xff]  ;;  %v2901_v63 = vpack.c.bf16 %v1126_v58, %v1125_v57  ;;  %v2475_v9 = vld [vmem:[%s3527_s27 + $0x48] sm:$0xff]  ;;  %v3786_v15 = vld [vmem:[%s3527_s27 + $0x32] sm:$0xff] }
  0x34   : > { %v3741_v1 = vpack.c.bf16 %v1158_v60, %v1157_v59  ;;  %v3760_v7 = vld [vmem:[%s3527_s27 + $0x22] sm:$0xff]  ;;  %v1131_v20 = vld [vmem:[%s4939_s1 + $0x250] sm:$0xff]  ;;  %v1132_v21 = vld [vmem:[%s4939_s1 + $0x258] sm:$0xff] }
  0x35   : > { %2821 = vmatpush1.bf16.msra.mxu1 %v2820_v49  ;;  %v1155_v49 = vld [vmem:[%s4939_s1 + $0x310] sm:$0xff]  ;;  %v1130_v12 = vld [vmem:[%s4939_s1 + $0x248] sm:$0xff]  ;;  %v1161_v13 = vld [vmem:[%s4939_s1 + $0x340] sm:$0xff]  ;;  %v2910_v26 = vpack.c.bf16 %v1132_v21, %v1131_v20 }
  0x36   : > { %2869 = vmatpush1.bf16.msra.mxu0 %v2868_v50  ;;  %2822 = vmatprep.subr.bf16.mxu1 %v4942_v3  ;;  %v1156_v50 = vld [vmem:[%s4939_s1 + $0x318] sm:$0xff]  ;;  %v1162_v14 = vld [vmem:[%s4939_s1 + $0x348] sm:$0xff]  ;;  %v2477_v27 = vld [vmem:[%s3527_s27 + $0x60] sm:$0xff] }
  0x37   : > { %2870 = vmatprep.subr.bf16.mxu0 %v4942_v3  ;;  %v3794_v19 = vpack.c.bf16 %v1162_v14, %v1161_v13  ;;  %v3812_v24 = vld [vmem:[%s3527_s27 + $0x3a] sm:$0xff]  ;;  %v3815_v25 = vld [vmem:[%s3527_s27 + $0x49] sm:$0xff] }
  0x38   : > { %v1134_v30 = vld [vmem:[%s4939_s1 + $0x268] sm:$0xff]  ;;  %v1165_v31 = vld [vmem:[%s4939_s1 + $0x360] sm:$0xff]  ;;  %v1135_v38 = vld [vmem:[%s4939_s1 + $0x270] sm:$0xff] }
  0x39   : > { %2824 = vmatpush1.bf16.msra.mxu1 %v2823_v55  ;;  %v2473_v55 = vld [vmem:[%s3527_s27 + $0x30] sm:$0xff]  ;;  %v1166_v32 = vld [vmem:[%s4939_s1 + $0x368] sm:$0xff]  ;;  %v1136_v39 = vld [vmem:[%s4939_s1 + $0x278] sm:$0xff] }
  0x3a   : > { %2872 = vmatpush1.bf16.msra.mxu0 %v2871_v56  ;;  %2825 = vmatprep.subr.bf16.mxu1 %v4942_v3  ;;  %v3716_v56 = vpack.c.bf16 %v1156_v50, %v1155_v49  ;;  %v3838_v33 = vld [vmem:[%s3527_s27 + $0x4a] sm:$0xff]  ;;  %v3846_v37 = vpack.c.bf16 %v1166_v32, %v1165_v31  ;;  %v2916_v46 = vpack.c.bf16 %v1136_v39, %v1135_v38  ;;  %v2479_v47 = vld [vmem:[%s3527_s27 + $0x78] sm:$0xff]  ;;  %v1137_v49 = vld [vmem:[%s4939_s1 + $0x280] sm:$0xff] }
  0x3b   : > { %2873 = vmatprep.subr.bf16.mxu0 %v4942_v3  ;;  %v2478_v36 = vld [vmem:[%s3527_s27 + $0x68] sm:$0xff]  ;;  %v2480_v58 = vld [vmem:[%s3527_s27 + $0x80] sm:$0xff]  ;;  %v1139_v60 = vld [vmem:[%s4939_s1 + $0x290] sm:$0xff] }
  0x3c   : > { %v1138_v50 = vld [vmem:[%s4939_s1 + $0x288] sm:$0xff]  ;;  %v1173_v13 = vld [vmem:[%s4939_s1 + $0x3a0] sm:$0xff]  ;;  %v3951_v21 = vld [vmem:[%s3527_s27 + $0x98] sm:$0xff] }
  0x3d   : > { %2827 = vmatpush1.bf16.msra.mxu1 %v2826_v61  ;;  %v3733_v61 = vld [vmem:[%s3527_s27 + $0x1a] sm:$0xff]  ;;  %v2919_v57 = vpack.c.bf16 %v1138_v50, %v1137_v49  ;;  %v1174_v14 = vld [vmem:[%s4939_s1 + $0x3a8] sm:$0xff]  ;;  %v3977_v31 = vld [vmem:[%s3527_s27 + $0x91] sm:$0xff] }
  0x3e   : > { %2875 = vmatpush1.bf16.msra.mxu0 %v2874_v62  ;;  %2828 = vmatprep.subr.bf16.mxu1 %v4942_v3  ;;  %v3736_v62 = vld [vmem:[%s3527_s27 + $0x21] sm:$0xff]  ;;  %v4009_v50 = vld [vmem:[%s3527_s27 + $0xb0] sm:$0xff] }
  0x3f   : > { %2876 = vmatprep.subr.bf16.mxu0 %v4942_v3  ;;  %v1145_v38 = vld [vmem:[%s4939_s1 + $0x2c0] sm:$0xff]  ;;  %v1146_v39 = vld [vmem:[%s4939_s1 + $0x2c8] sm:$0xff] }
  0x40   : > { %v2931_v49 = vpack.c.bf16 %v1146_v39, %v1145_v38  ;;  %v1151_v38 = vld [vmem:[%s4939_s1 + $0x2f0] sm:$0xff]  ;;  %v1152_v39 = vld [vmem:[%s4939_s1 + $0x2f8] sm:$0xff] }
  0x41   : > { %2830 = vmatpush1.bf16.msra.mxu1 %v2829_v4  ;;  %v1128_v4 = vld [vmem:[%s4939_s1 + $0x238] sm:$0xff] }
  0x42   : > { %2878 = vmatpush1.bf16.msra.mxu0 %v2877_v5  ;;  %2831 = vmatprep.subr.bf16.mxu1 %v4942_v3  ;;  %v1159_v5 = vld [vmem:[%s4939_s1 + $0x330] sm:$0xff] }
  0x43   : > { %2879 = vmatprep.subr.bf16.mxu0 %v4942_v3 }
  0x45   : > { %2833 = vmatpush1.bf16.msra.mxu1 %v2832_v10  ;;  %v3768_v10 = vpack.c.bf16 %v1160_v6, %v1159_v5  ;;  %v3919_v5 = vld [vmem:[%s3527_s27 + $0x79] sm:$0xff] }
  0x46   : > { %2881 = vmatpush1.bf16.msra.mxu0 %v2880_v11  ;;  %2834 = vmatprep.subr.bf16.mxu1 %v4942_v3  ;;  %v1129_v11 = vld [vmem:[%s4939_s1 + $0x240] sm:$0xff] }
  0x47   : > { %2882 = vmatprep.subr.bf16.mxu0 %v4942_v3 }
  0x49   : > { %2836 = vmatpush1.bf16.msra.mxu1 %v2835_v16  ;;  %v3789_v16 = vld [vmem:[%s3527_s27 + $0x39] sm:$0xff] }
  0x4a   : > { %2884 = vmatpush1.bf16.msra.mxu0 %v2883_v17  ;;  %2837 = vmatprep.subr.bf16.mxu1 %v4942_v3  ;;  %v2907_v17 = vpack.c.bf16 %v1130_v12, %v1129_v11  ;;  %v1141_v11 = vld [vmem:[%s4939_s1 + $0x2a0] sm:$0xff]  ;;  %v1142_v12 = vld [vmem:[%s4939_s1 + $0x2a8] sm:$0xff] }
  0x4b   : > { %2885 = vmatprep.subr.bf16.mxu0 %v4942_v3  ;;  %v2925_v20 = vpack.c.bf16 %v1142_v12, %v1141_v11  ;;  %v1149_v12 = vld [vmem:[%s4939_s1 + $0x2e0] sm:$0xff] }
  0x4d   : > { %2839 = vmatpush1.bf16.msra.mxu1 %v2838_v22  ;;  %v1163_v22 = vld [vmem:[%s4939_s1 + $0x350] sm:$0xff] }
  0x4e   : > { %2887 = vmatpush1.bf16.msra.mxu0 %v2886_v23  ;;  %2840 = vmatprep.subr.bf16.mxu1 %v4942_v3  ;;  %v1164_v23 = vld [vmem:[%s4939_s1 + $0x358] sm:$0xff] }
  0x4f   : > { %2888 = vmatprep.subr.bf16.mxu0 %v4942_v3 }
  0x51   : > { %2842 = vmatpush1.bf16.msra.mxu1 %v2841_v28  ;;  %v3820_v28 = vpack.c.bf16 %v1164_v23, %v1163_v22  ;;  %v3955_v22 = vpack.c.bf16 %v1174_v14, %v1173_v13  ;;  %v1143_v23 = vld [vmem:[%s4939_s1 + $0x2b0] sm:$0xff]  ;;  %v1150_v13 = vld [vmem:[%s4939_s1 + $0x2e8] sm:$0xff]  ;;  %v1181_v14 = vld [vmem:[%s4939_s1 + $0x3e0] sm:$0xff] }
  0x52   : > { %2890 = vmatpush1.bf16.msra.mxu0 %v2889_v29  ;;  %2843 = vmatprep.subr.bf16.mxu1 %v4942_v3  ;;  %v1133_v29 = vld [vmem:[%s4939_s1 + $0x260] sm:$0xff] }
  0x53   : > { %2891 = vmatprep.subr.bf16.mxu0 %v4942_v3  ;;  %5003 = vst [vmem:[#allocation6_spill] sm:$0xff] %v3955_v22 }
  0x55   : > { %2845 = vmatpush1.bf16.msra.mxu1 %v2844_v34  ;;  %v3841_v34 = vld [vmem:[%s3527_s27 + $0x51] sm:$0xff] }
  0x56   : > { %2893 = vmatpush1.bf16.msra.mxu0 %v2892_v35  ;;  %3022 = vmatprep.subr.bf16.mxu1 %v4942_v3  ;;  %v2913_v35 = vpack.c.bf16 %v1134_v30, %v1133_v29  ;;  %v1176_v29 = vld [vmem:[%s4939_s1 + $0x3b8] sm:$0xff]  ;;  %v3974_v30 = vld [vmem:[%s3527_s27 + $0x82] sm:$0xff] }
  0x57   : > { %2894 = vmatprep.subr.bf16.mxu0 %v4942_v3 }
  0x58   : > { %1273 = vmatmul.mubr.f32.vlgmr.msra.gmra.mrb[0].mxu1 %v187_v40  ;;  %v1167_v40 = vld [vmem:[%s4939_s1 + $0x370] sm:$0xff] }
  0x59   : > { %1498 = vmatmul.mubr.f32.vlgmr.msra.gmra.mrb[0].mxu0 %v315_v43  ;;  %3038 = vmatpush1.bf16.msra.mxu1 %v3689_v41  ;;  %v1168_v43 = vld [vmem:[%s4939_s1 + $0x378] sm:$0xff] }
  0x5a   : > { %2896 = vmatpush1.bf16.msra.mxu0 %v2895_v44  ;;  %1277 = vmatprep.mubr.f32.mxu1 %v252_v45  ;;  %v3864_v44 = vld [vmem:[%s3527_s27 + $0x52] sm:$0xff]  ;;  %v3867_v45 = vld [vmem:[%s3527_s27 + $0x61] sm:$0xff] }
  0x5b   : > { %1502 = vmatprep.mubr.f32.mxu0 %v2472_v48  ;;  %2897 = vmatprep.subr.bf16.mxu0 %v4942_v3 }
  0x5c   : > { %1278 = vmatmul.mubr.f32.gmra.mrb[2].mxu1 %v188_v51  ;;  %3023 = vmatprep.subr.bf16.mxu1 %v4942_v3  ;;  %v1169_v51 = vld [vmem:[%s4939_s1 + $0x380] sm:$0xff] }
  0x5d   : > { %1503 = vmatmul.mubr.f32.gmra.mrb[2].mxu0 %v316_v52  ;;  %1282 = vmatprep.mubr.f32.mxu1 %v3712_v53  ;;  %v1170_v52 = vld [vmem:[%s4939_s1 + $0x388] sm:$0xff] }
  0x5e   : > { %1507 = vmatprep.mubr.f32.mxu0 %v2473_v55  ;;  %2899 = vmatpush1.bf16.msra.mxu0 %v2898_v54  ;;  %v3890_v54 = vld [vmem:[%s3527_s27 + $0x62] sm:$0xff]  ;;  %v3898_v59 = vpack.c.bf16 %v1170_v52, %v1169_v51  ;;  %v1147_v52 = vld [vmem:[%s4939_s1 + $0x2d0] sm:$0xff] }
  0x5f   : > { %3039 = vmatpush1.bf16.msra.mxu1 %v3716_v56  ;;  %2900 = vmatprep.subr.bf16.mxu0 %v4942_v3 }
  0x60   : > { %1283 = vmatmul.mubr.f32.gmra.mrb[4].mxu1 %v3545_v42  ;;  %3024 = vmatprep.subr.bf16.mxu1 %v4942_v3  ;;  %v2904_v42 = vpack.c.bf16 %v1128_v4, %v1127_v2  ;;  %v1172_v2 = vld [vmem:[%s4939_s1 + $0x398] sm:$0xff]  ;;  %v3916_v4 = vld [vmem:[%s3527_s27 + $0x6a] sm:$0xff] }
  0x61   : > { %1508 = vmatmul.mubr.f32.gmra.mrb[4].mxu0 %v3733_v61  ;;  %1287 = vmatprep.mubr.f32.mxu1 %v3736_v62 }
  0x62   : > { %1512 = vmatprep.mubr.f32.mxu0 %v2474_v0  ;;  %2902 = vmatpush1.bf16.msra.mxu0 %v2901_v63  ;;  %v1140_v63 = vld [vmem:[%s4939_s1 + $0x298] sm:$0xff] }
  0x63   : > { %3040 = vmatpush1.bf16.msra.mxu1 %v3741_v1  ;;  %2903 = vmatprep.subr.bf16.mxu0 %v4942_v3  ;;  %v2922_v6 = vpack.c.bf16 %v1140_v63, %v1139_v60  ;;  %v1180_v60 = vld [vmem:[%s4939_s1 + $0x3d8] sm:$0xff] }
  0x64   : > { %1288 = vmatmul.mubr.f32.gmra.mrb[6].mxu1 %v2472_v48  ;;  %3025 = vmatprep.subr.bf16.mxu1 %v4942_v3  ;;  %v3872_v48 = vpack.c.bf16 %v1168_v43, %v1167_v40  ;;  %v1177_v40 = vld [vmem:[%s4939_s1 + $0x3c0] sm:$0xff]  ;;  %v1178_v43 = vld [vmem:[%s4939_s1 + $0x3c8] sm:$0xff] }
  0x65   : > { %1513 = vmatmul.mubr.f32.gmra.mrb[6].mxu0 %v3760_v7  ;;  %1292 = vmatprep.mubr.f32.mxu1 %v3763_v8  ;;  %v4013_v51 = vpack.c.bf16 %v1178_v43, %v1177_v40  ;;  %v4033_v63 = vld [vmem:[%s3527_s27 + $0x9a] sm:$0xff]  ;;  %v1183_v40 = vld [vmem:[%s4939_s1 + $0x3f0] sm:$0xff] }
  0x66   : > { %1517 = vmatprep.mubr.f32.mxu0 %v2475_v9  ;;  %2905 = vmatpush1.bf16.msra.mxu0 %v2904_v42  ;;  %v3922_v42 = vld [vmem:[%s3527_s27 + $0x90] sm:$0xff]  ;;  %5006 = vst [vmem:[#allocation9_spill] sm:$0xff] %v4033_v63  ;;  %v1184_v43 = vld [vmem:[%s4939_s1 + $0x3f8] sm:$0xff] }
  0x67   : > { %3041 = vmatpush1.bf16.msra.mxu1 %v3768_v10  ;;  %2906 = vmatprep.subr.bf16.mxu0 %v4942_v3  ;;  %5005 = vst [vmem:[#allocation8_spill] sm:$0xff] %v4013_v51 }
  0x68   : > { %1293 = vmatmul.mubr.f32.gmra.mrb[8].mxu1 %v2473_v55  ;;  %3026 = vmatprep.subr.bf16.mxu1 %v4942_v3  ;;  %v3893_v55 = vld [vmem:[%s3527_s27 + $0x69] sm:$0xff] }
  0x69   : > { %1518 = vmatmul.mubr.f32.gmra.mrb[8].mxu0 %v3786_v15  ;;  %1297 = vmatprep.mubr.f32.mxu1 %v3789_v16 }
  0x6a   : > { %1522 = vmatprep.mubr.f32.mxu0 %v2476_v18  ;;  %2908 = vmatpush1.bf16.msra.mxu0 %v2907_v17  ;;  %v3945_v17 = vld [vmem:[%s3527_s27 + $0x7a] sm:$0xff] }
  0x6b   : > { %3042 = vmatpush1.bf16.msra.mxu1 %v3794_v19  ;;  %2909 = vmatprep.subr.bf16.mxu0 %v4942_v3 }
  0x6c   : > { %1298 = vmatmul.mubr.f32.gmra.mrb[10].mxu1 %v2474_v0  ;;  %3027 = vmatprep.subr.bf16.mxu1 %v4942_v3  ;;  %v1171_v0 = vld [vmem:[%s4939_s1 + $0x390] sm:$0xff] }
  0x6d   : > { %1523 = vmatmul.mubr.f32.gmra.mrb[10].mxu0 %v3812_v24  ;;  %1302 = vmatprep.mubr.f32.mxu1 %v3815_v25 }
  0x6e   : > { %1527 = vmatprep.mubr.f32.mxu0 %v2477_v27  ;;  %2911 = vmatpush1.bf16.msra.mxu0 %v2910_v26  ;;  %v1144_v26 = vld [vmem:[%s4939_s1 + $0x2b8] sm:$0xff] }
  0x6f   : > { %3043 = vmatpush1.bf16.msra.mxu1 %v3820_v28  ;;  %2912 = vmatprep.subr.bf16.mxu0 %v4942_v3  ;;  %v2928_v32 = vpack.c.bf16 %v1144_v26, %v1143_v23  ;;  %v4063_v23 = vld [vmem:[%s3527_s27 + $0xaa] sm:$0xff] }
  0x70   : > { %1303 = vmatmul.mubr.f32.gmra.mrb[12].mxu1 %v2475_v9  ;;  %3028 = vmatprep.subr.bf16.mxu1 %v4942_v3  ;;  %v3926_v9 = vpack.c.bf16 %v1172_v2, %v1171_v0  ;;  %v4036_v0 = vld [vmem:[%s3527_s27 + $0xa9] sm:$0xff]  ;;  %5008 = vst [vmem:[#allocation11_spill] sm:$0xff] %v4063_v23  ;;  %v4066_v26 = vld [vmem:[%s3527_s27 + $0xb1] sm:$0xff] }
  0x71   : > { %1528 = vmatmul.mubr.f32.gmra.mrb[12].mxu0 %v3838_v33  ;;  %1307 = vmatprep.mubr.f32.mxu1 %v3841_v34 }
  0x72   : > { %1532 = vmatprep.mubr.f32.mxu0 %v2478_v36  ;;  %2914 = vmatpush1.bf16.msra.mxu0 %v2913_v35  ;;  %v3980_v35 = vld [vmem:[%s3527_s27 + $0xa8] sm:$0xff] }
  0x73   : > { %3044 = vmatpush1.bf16.msra.mxu1 %v3846_v37  ;;  %2915 = vmatprep.subr.bf16.mxu0 %v4942_v3 }
  0x74   : > { %1308 = vmatmul.mubr.f32.gmra.mrb[14].mxu1 %v2476_v18  ;;  %3029 = vmatprep.subr.bf16.mxu1 %v4942_v3  ;;  %v3948_v18 = vld [vmem:[%s3527_s27 + $0x81] sm:$0xff] }
  0x75   : > { %1533 = vmatmul.mubr.f32.gmra.mrb[14].mxu0 %v3864_v44  ;;  %1312 = vmatprep.mubr.f32.mxu1 %v3867_v45 }
  0x76   : > { %1537 = vmatprep.mubr.f32.mxu0 %v2479_v47  ;;  %2917 = vmatpush1.bf16.msra.mxu0 %v2916_v46  ;;  %v4003_v46 = vld [vmem:[%s3527_s27 + $0x92] sm:$0xff] }
  0x77   : > { %3045 = vmatpush1.bf16.msra.mxu1 %v3872_v48  ;;  %2918 = vmatprep.subr.bf16.mxu0 %v4942_v3 }
  0x78   : > { %1313 = vmatmul.mubr.f32.gmra.mrb[16].mxu1 %v2477_v27  ;;  %3030 = vmatprep.subr.bf16.mxu1 %v4942_v3  ;;  %v1175_v27 = vld [vmem:[%s4939_s1 + $0x3b0] sm:$0xff] }
  0x79   : > { %1538 = vmatmul.mubr.f32.gmra.mrb[16].mxu0 %v3890_v54  ;;  %1317 = vmatprep.mubr.f32.mxu1 %v3893_v55 }
  0x7a   : > { %1542 = vmatprep.mubr.f32.mxu0 %v2480_v58  ;;  %2920 = vmatpush1.bf16.msra.mxu0 %v2919_v57  ;;  %v1148_v57 = vld [vmem:[%s4939_s1 + $0x2d8] sm:$0xff] }
  0x7b   : > { %3046 = vmatpush1.bf16.msra.mxu1 %v3898_v59  ;;  %2921 = vmatprep.subr.bf16.mxu0 %v4942_v3  ;;  %v2934_v2 = vpack.c.bf16 %v1148_v57, %v1147_v52  ;;  %v1186_v52 = vld [vmem:[%s4939_s1 + $0x408] sm:$0xff]  ;;  %v4099_v57 = vld [vmem:[%s3527_s27 + $0xb2] sm:$0xff] }
  0x7c   : > { %1318 = vmatmul.mubr.f32.gmra.mrb[18].mxu1 %v2478_v36  ;;  %3031 = vmatprep.subr.bf16.mxu1 %v4942_v3  ;;  %v3984_v36 = vpack.c.bf16 %v1176_v29, %v1175_v27  ;;  %v2937_v27 = vpack.c.bf16 %v1150_v13, %v1149_v12  ;;  %v4069_v29 = vld [vmem:[%s3527_s27 + $0xc8] sm:$0xff]  ;;  %5010 = vst [vmem:[#allocation13_spill] sm:$0xff] %v4099_v57 }
  0x7d   : > { %1543 = vmatmul.mubr.f32.gmra.mrb[18].mxu0 %v3916_v4  ;;  %1322 = vmatprep.mubr.f32.mxu1 %v3919_v5  ;;  %v4109_v12 = vpack.c.bf16 %v1184_v43, %v1183_v40  ;;  %v4141_v40 = vld [vmem:[%s3527_s27 + $0xf0] sm:$0xff]  ;;  %v4148_v43 = vld [vmem:[%s3527_s27 + $0xda] sm:$0xff] }
  0x7e   : > { %1547 = vmatprep.mubr.f32.mxu0 %v3922_v42  ;;  %2923 = vmatpush1.bf16.msra.mxu0 %v2922_v6  ;;  %5004 = vst [vmem:[#allocation7_spill] sm:$0xff] %v3984_v36  ;;  %v4039_v6 = vld [vmem:[%s3527_s27 + $0xc0] sm:$0xff]  ;;  %5014 = vst [vmem:[#allocation17_spill] sm:$0xff] %v4148_v43 }
  0x7f   : > { %3047 = vmatpush1.bf16.msra.mxu1 %v3926_v9  ;;  %2924 = vmatprep.subr.bf16.mxu0 %v4942_v3  ;;  %5011 = vst [vmem:[#allocation14_spill] sm:$0xff] %v4109_v12 }
  0x80   : > { %1323 = vmatmul.mubr.f32.gmra.mrb[20].mxu1 %v2479_v47  ;;  %3032 = vmatprep.subr.bf16.mxu1 %v4942_v3  ;;  %v4006_v47 = vld [vmem:[%s3527_s27 + $0x99] sm:$0xff] }
  0x81   : > { %1548 = vmatmul.mubr.f32.gmra.mrb[20].mxu0 %v3945_v17  ;;  %1327 = vmatprep.mubr.f32.mxu1 %v3948_v18 }
  0x82   : > { %1552 = vmatprep.mubr.f32.mxu0 %v3951_v21  ;;  %2926 = vmatpush1.bf16.msra.mxu0 %v2925_v20  ;;  %v1182_v20 = vld [vmem:[%s4939_s1 + $0x3e8] sm:$0xff] }
  0x83   : > { %3048 = vmatpush1.bf16.msra.mxu1 %v3955_v22  ;;  %2927 = vmatprep.subr.bf16.mxu0 %v4942_v3  ;;  %v4229_v22 = vld [vmem:[%s3527_s27 + $0x129] sm:$0xff] }
  0x84   : > { %1328 = vmatmul.mubr.f32.gmra.mrb[22].mxu1 %v2480_v58  ;;  %3033 = vmatprep.subr.bf16.mxu1 %v4942_v3  ;;  %v1179_v58 = vld [vmem:[%s4939_s1 + $0x3d0] sm:$0xff]  ;;  %5026 = vst [vmem:[#allocation29_spill] sm:$0xff] %v4229_v22 }
  0x85   : > { %1553 = vmatmul.mubr.f32.gmra.mrb[22].mxu0 %v3974_v30  ;;  %1332 = vmatprep.mubr.f32.mxu1 %v3977_v31  ;;  %v4043_v11 = vpack.c.bf16 %v1180_v60, %v1179_v58  ;;  %v4102_v58 = vld [vmem:[%s3527_s27 + $0xc1] sm:$0xff]  ;;  %v2940_v60 = vpack.c.bf16 %v1152_v39, %v1151_v38  ;;  %v4135_v38 = vld [vmem:[%s3527_s27 + $0xca] sm:$0xff]  ;;  %v4138_v39 = vld [vmem:[%s3527_s27 + $0xd9] sm:$0xff] }
  0x86   : > { %1557 = vmatprep.mubr.f32.mxu0 %v3980_v35  ;;  %2929 = vmatpush1.bf16.msra.mxu0 %v2928_v32  ;;  %v4073_v32 = vpack.c.bf16 %v1182_v20, %v1181_v14  ;;  %v4119_v14 = vld [vmem:[%s3527_s27 + $0xc2] sm:$0xff]  ;;  %5013 = vst [vmem:[#allocation16_spill] sm:$0xff] %v4135_v38 }
  0x87   : > { %3049 = vmatpush1.bf16.msra.mxu1 %v3984_v36  ;;  %2930 = vmatprep.subr.bf16.mxu0 %v4942_v3  ;;  %5007 = vst [vmem:[#allocation10_spill] sm:$0xff] %v4043_v11  ;;  %5012 = vst [vmem:[#allocation15_spill] sm:$0xff] %v4119_v14  ;;  %v4122_v20 = vld [vmem:[%s3527_s27 + $0xc9] sm:$0xff]  ;;  %v4216_v36 = vld [vmem:[%s3527_s27 + $0x121] sm:$0xff] }
  0x88   : > { %1333 = vmatmul.mubr.f32.gmra.mrb[24].mxu1 %v3922_v42  ;;  %3034 = vmatprep.subr.bf16.mxu1 %v4942_v3  ;;  %5009 = vst [vmem:[#allocation12_spill] sm:$0xff] %v4073_v32  ;;  %5023 = vst [vmem:[#allocation26_spill] sm:$0xff] %v4216_v36 }
  0x89   : > { %1558 = vmatmul.mubr.f32.gmra.mrb[24].mxu0 %v4003_v46  ;;  %1337 = vmatprep.mubr.f32.mxu1 %v4006_v47 }
  0x8a   : > { %1562 = vmatprep.mubr.f32.mxu0 %v4009_v50  ;;  %2932 = vmatpush1.bf16.msra.mxu0 %v2931_v49  ;;  %v1185_v49 = vld [vmem:[%s4939_s1 + $0x400] sm:$0xff] }
  0x8b   : > { %3050 = vmatpush1.bf16.msra.mxu1 %v4013_v51  ;;  %2933 = vmatprep.subr.bf16.mxu0 %v4942_v3  ;;  %v4113_v13 = vpack.c.bf16 %v1186_v52, %v1185_v49  ;;  %v4151_v49 = vld [vmem:[%s3527_s27 + $0xe1] sm:$0xff]  ;;  %v4154_v52 = vld [vmem:[%s3527_s27 + $0xf8] sm:$0xff] }
  0x8c   : > { %1338 = vmatmul.mubr.f32.gmra.mrb[26].mxu1 %v3951_v21  ;;  %3035 = vmatprep.subr.bf16.mxu1 %v4942_v3  ;;  %v4203_v51 = vld [vmem:[%s3527_s27 + $0x111] sm:$0xff] }
  0x8d   : > { %1563 = vmatmul.mubr.f32.gmra.mrb[26].mxu0 %v4033_v63  ;;  %1342 = vmatprep.mubr.f32.mxu1 %v4036_v0  ;;  %v4232_v63 = vld [vmem:[%s3527_s27 + $0x140] sm:$0xff] }
  0x8e   : > { %1567 = vmatprep.mubr.f32.mxu0 %v4039_v6  ;;  %2935 = vmatpush1.bf16.msra.mxu0 %v2934_v2  ;;  %v4105_v2 = vld [vmem:[%s3527_s27 + $0xd8] sm:$0xff]  ;;  %5027 = vst [vmem:[#allocation30_spill] sm:$0xff] %v4232_v63 }
  0x8f   : > { %3051 = vmatpush1.bf16.msra.mxu1 %v4043_v11  ;;  %2936 = vmatprep.subr.bf16.mxu0 %v4942_v3  ;;  %v4190_v11 = vld [vmem:[%s3527_s27 + $0x109] sm:$0xff] }
  0x90   : > { %1343 = vmatmul.mubr.f32.gmra.mrb[28].mxu1 %v3980_v35  ;;  %3036 = vmatprep.subr.bf16.mxu1 %v4942_v3 }
  0x91   : > { %1568 = vmatmul.mubr.f32.gmra.mrb[28].mxu0 %v4063_v23  ;;  %1347 = vmatprep.mubr.f32.mxu1 %v4066_v26  ;;  %v4219_v23 = vld [vmem:[%s3527_s27 + $0x138] sm:$0xff] }
  0x92   : > { %1572 = vmatprep.mubr.f32.mxu0 %v4069_v29  ;;  %2938 = vmatpush1.bf16.msra.mxu0 %v2937_v27  ;;  %v4125_v27 = vld [vmem:[%s3527_s27 + $0xe0] sm:$0xff]  ;;  %5024 = vst [vmem:[#allocation27_spill] sm:$0xff] %v4219_v23 }
  0x93   : > { %3052 = vmatpush1.bf16.msra.mxu1 %v4073_v32  ;;  %2939 = vmatprep.subr.bf16.mxu0 %v4942_v3  ;;  %v4177_v32 = vld [vmem:[%s3527_s27 + $0xf9] sm:$0xff] }
  0x94   : > { %1348 = vmatmul.mubr.f32.gmra.mrb[30].mxu1 %v4009_v50  ;;  %3037 = vmatprep.subr.bf16.mxu1 %v4942_v3 }
  0x95   : > { %1573 = vmatmul.mubr.f32.gmra.mrb[30].mxu0 %v4099_v57  ;;  %1352 = vmatprep.mubr.f32.mxu1 %v4102_v58  ;;  %v4206_v57 = vld [vmem:[%s3527_s27 + $0x128] sm:$0xff] }
  0x96   : > { %1577 = vmatprep.mubr.f32.mxu0 %v4105_v2  ;;  %2941 = vmatpush1.bf16.msra.mxu0 %v2940_v60  ;;  %v4161_v60 = vld [vmem:[%s3527_s27 + $0xe2] sm:$0xff]  ;;  %5021 = vst [vmem:[#allocation24_spill] sm:$0xff] %v4206_v57 }
  0x97   : > { %3053 = vmatpush1.bf16.msra.mxu1 %v4109_v12  ;;  %2942 = vmatprep.subr.bf16.mxu0 %v4942_v3  ;;  %5015 = vst [vmem:[#allocation18_spill] sm:$0xff] %v4161_v60  ;;  %v4164_v3 = vld [vmem:[%s3527_s27 + $0xf1] sm:$0xff]  ;;  %v4167_v12 = vld [vmem:[%s3527_s27 + $0x108] sm:$0xff] }
  0x98   : > { %1353 = vmatmul.mubr.f32.gmra.mrb[32].mxu1 %v4039_v6  ;;  %2991 = vmatprep.subr.bf16.mxu1 %v4113_v13 }
  0x99   : > { %1578 = vmatmul.mubr.f32.gmra.mrb[32].mxu0 %v4119_v14  ;;  %1357 = vmatprep.mubr.f32.mxu1 %v4122_v20  ;;  %v4193_v14 = vld [vmem:[%s3527_s27 + $0x120] sm:$0xff] }
  0x9a   : > { %1582 = vmatprep.mubr.f32.mxu0 %v4125_v27  ;;  %5019 = vst [vmem:[#allocation22_spill] sm:$0xff] %v4193_v14 }
  0x9c   : > { %1358 = vmatmul.mubr.f32.gmra.mrb[34].mxu1 %v4069_v29 }
  0x9d   : > { %1583 = vmatmul.mubr.f32.gmra.mrb[34].mxu0 %v4135_v38  ;;  %1362 = vmatprep.mubr.f32.mxu1 %v4138_v39  ;;  %v4180_v38 = vld [vmem:[%s3527_s27 + $0x110] sm:$0xff] }
  0x9e   : > { %1587 = vmatprep.mubr.f32.mxu0 %v4141_v40  ;;  %5017 = vst [vmem:[#allocation20_spill] sm:$0xff] %v4180_v38 }
  0xa0   : > { %1363 = vmatmul.mubr.f32.gmra.mrb[36].mxu1 %v4105_v2 }
  0xa1   : > { %1588 = vmatmul.mubr.f32.gmra.mrb[36].mxu0 %v4148_v43  ;;  %1367 = vmatprep.mubr.f32.mxu1 %v4151_v49  ;;  %v4174_v43 = vld [vmem:[%s3527_s27 + $0xf2] sm:$0xff] }
  0xa2   : > { %1592 = vmatprep.mubr.f32.mxu0 %v4154_v52  ;;  %5016 = vst [vmem:[#allocation19_spill] sm:$0xff] %v4174_v43 }
  0xa4   : > { %1368 = vmatmul.mubr.f32.gmra.mrb[38].mxu1 %v4125_v27 }
  0xa5   : > { %1593 = vmatmul.mubr.f32.gmra.mrb[38].mxu0 %v4161_v60  ;;  %1372 = vmatprep.mubr.f32.mxu1 %v4164_v3  ;;  %v4187_v60 = vld [vmem:[%s3527_s27 + $0xfa] sm:$0xff] }
  0xa6   : > { %1597 = vmatprep.mubr.f32.mxu0 %v4167_v12  ;;  %5018 = vst [vmem:[#allocation21_spill] sm:$0xff] %v4187_v60 }
  0xa8   : > { %1373 = vmatmul.mubr.f32.gmra.mrb[40].mxu1 %v4141_v40 }
  0xa9   : > { %1598 = vmatmul.mubr.f32.gmra.mrb[40].mxu0 %v4174_v43  ;;  %1377 = vmatprep.mubr.f32.mxu1 %v4177_v32  ;;  %v4200_v43 = vld [vmem:[%s3527_s27 + $0x10a] sm:$0xff] }
  0xaa   : > { %1602 = vmatprep.mubr.f32.mxu0 %v4180_v38  ;;  %5020 = vst [vmem:[#allocation23_spill] sm:$0xff] %v4200_v43 }
  0xac   : > { %1378 = vmatmul.mubr.f32.gmra.mrb[42].mxu1 %v4154_v52 }
  0xad   : > { %1603 = vmatmul.mubr.f32.gmra.mrb[42].mxu0 %v4187_v60  ;;  %1382 = vmatprep.mubr.f32.mxu1 %v4190_v11  ;;  %v4213_v60 = vld [vmem:[%s3527_s27 + $0x112] sm:$0xff] }
  0xae   : > { %1607 = vmatprep.mubr.f32.mxu0 %v4193_v14  ;;  %5022 = vst [vmem:[#allocation25_spill] sm:$0xff] %v4213_v60 }
  0xb0   : > { %1383 = vmatmul.mubr.f32.gmra.mrb[44].mxu1 %v4167_v12 }
  0xb1   : > { %1608 = vmatmul.mubr.f32.gmra.mrb[44].mxu0 %v4200_v43  ;;  %1387 = vmatprep.mubr.f32.mxu1 %v4203_v51  ;;  %v4226_v43 = vld [vmem:[%s3527_s27 + $0x122] sm:$0xff] }
  0xb2   : > { %1612 = vmatprep.mubr.f32.mxu0 %v4206_v57  ;;  %5025 = vst [vmem:[#allocation28_spill] sm:$0xff] %v4226_v43 }
  0xb4   : > { %1388 = vmatmul.mubr.f32.gmra.mrb[46].mxu1 %v4180_v38  ;;  %v4245_v38 = vld [vmem:[%s3527_s27 + $0x150] sm:$0xff] }
  0xb5   : > { %1613 = vmatmul.mubr.f32.gmra.mrb[46].mxu0 %v4213_v60  ;;  %1392 = vmatprep.mubr.f32.mxu1 %v4216_v36  ;;  %v4239_v60 = vld [vmem:[%s3527_s27 + $0x12a] sm:$0xff]  ;;  %v4242_v36 = vld [vmem:[%s3527_s27 + $0x139] sm:$0xff]  ;;  %5030 = vst [vmem:[#allocation33_spill] sm:$0xff] %v4245_v38 }
  0xb6   : > { %1617 = vmatprep.mubr.f32.mxu0 %v4219_v23  ;;  %5028 = vst [vmem:[#allocation31_spill] sm:$0xff] %v4239_v60  ;;  %5029 = vst [vmem:[#allocation32_spill] sm:$0xff] %v4242_v36 }
  0xb8   : > { %1393 = vmatmul.mubr.f32.gmra.mrb[48].mxu1 %v4193_v14  ;;  %v4258_v14 = vld [vmem:[%s3527_s27 + $0x158] sm:$0xff] }
  0xb9   : > { %1618 = vmatmul.mubr.f32.gmra.mrb[48].mxu0 %v4226_v43  ;;  %1397 = vmatprep.mubr.f32.mxu1 %v4229_v22  ;;  %v4252_v43 = vld [vmem:[%s3527_s27 + $0x13a] sm:$0xff]  ;;  %5033 = vst [vmem:[#allocation36_spill] sm:$0xff] %v4258_v14 }
  0xba   : > { %1622 = vmatprep.mubr.f32.mxu0 %v4232_v63  ;;  %5031 = vst [vmem:[#allocation34_spill] sm:$0xff] %v4252_v43  ;;  %v4255_v22 = vld [vmem:[%s3527_s27 + $0x141] sm:$0xff] }
  0xbb   : > { %5032 = vst [vmem:[#allocation35_spill] sm:$0xff] %v4255_v22 }
  0xbc   : > { %1398 = vmatmul.mubr.f32.gmra.mrb[50].mxu1 %v4206_v57  ;;  %v4271_v57 = vld [vmem:[%s3527_s27 + $0x168] sm:$0xff] }
  0xbd   : > { %1623 = vmatmul.mubr.f32.gmra.mrb[50].mxu0 %v4239_v60  ;;  %1402 = vmatprep.mubr.f32.mxu1 %v4242_v36  ;;  %v4265_v60 = vld [vmem:[%s3527_s27 + $0x142] sm:$0xff]  ;;  %v4268_v36 = vld [vmem:[%s3527_s27 + $0x151] sm:$0xff] }
  0xbe   : > { %1627 = vmatprep.mubr.f32.mxu0 %v4245_v38  ;;  %5034 = vst [vmem:[#allocation37_spill] sm:$0xff] %v4265_v60  ;;  %5035 = vst [vmem:[#allocation38_spill] sm:$0xff] %v4268_v36 }
  0xc0   : > { %1403 = vmatmul.mubr.f32.gmra.mrb[52].mxu1 %v4219_v23  ;;  %v4284_v23 = vld [vmem:[%s3527_s27 + $0x170] sm:$0xff] }
  0xc1   : > { %1628 = vmatmul.mubr.f32.gmra.mrb[52].mxu0 %v4252_v43  ;;  %1407 = vmatprep.mubr.f32.mxu1 %v4255_v22  ;;  %v4278_v43 = vld [vmem:[%s3527_s27 + $0x152] sm:$0xff] }
  0xc2   : > { %1632 = vmatprep.mubr.f32.mxu0 %v4258_v14  ;;  %5036 = vst [vmem:[#allocation39_spill] sm:$0xff] %v4278_v43  ;;  %v4281_v22 = vld [vmem:[%s3527_s27 + $0x159] sm:$0xff] }
  0xc3   : > { %5037 = vst [vmem:[#allocation40_spill] sm:$0xff] %v4281_v22 }
  0xc4   : > { %1408 = vmatmul.mubr.f32.gmra.mrb[54].mxu1 %v4232_v63  ;;  %v4297_v63 = vld [vmem:[%s3527_s27 + $0x180] sm:$0xff] }
  0xc5   : > { %1633 = vmatmul.mubr.f32.gmra.mrb[54].mxu0 %v4265_v60  ;;  %1412 = vmatprep.mubr.f32.mxu1 %v4268_v36  ;;  %v4291_v60 = vld [vmem:[%s3527_s27 + $0x15a] sm:$0xff]  ;;  %v4294_v36 = vld [vmem:[%s3527_s27 + $0x169] sm:$0xff]  ;;  %5039 = vst [vmem:[#allocation42_spill] sm:$0xff] %v4297_v63 }
  0xc6   : > { %1637 = vmatprep.mubr.f32.mxu0 %v4271_v57  ;;  %5038 = vst [vmem:[#allocation41_spill] sm:$0xff] %v4291_v60 }
  0xc8   : > { %1413 = vmatmul.mubr.f32.gmra.mrb[56].mxu1 %v4245_v38  ;;  %v4310_v38 = vld [vmem:[%s3527_s27 + $0x188] sm:$0xff] }
  0xc9   : > { %1638 = vmatmul.mubr.f32.gmra.mrb[56].mxu0 %v4278_v43  ;;  %1417 = vmatprep.mubr.f32.mxu1 %v4281_v22  ;;  %v4304_v43 = vld [vmem:[%s3527_s27 + $0x16a] sm:$0xff]  ;;  %5041 = vst [vmem:[#allocation44_spill] sm:$0xff] %v4310_v38 }
  0xca   : > { %1642 = vmatprep.mubr.f32.mxu0 %v4284_v23  ;;  %5040 = vst [vmem:[#allocation43_spill] sm:$0xff] %v4304_v43  ;;  %v4307_v22 = vld [vmem:[%s3527_s27 + $0x171] sm:$0xff] }
  0xcc   : > { %1418 = vmatmul.mubr.f32.gmra.mrb[58].mxu1 %v4258_v14  ;;  %v4317_v14 = vld [vmem:[%s3527_s27 + $0x172] sm:$0xff] }
  0xcd   : > { %1643 = vmatmul.mubr.f32.gmra.mrb[58].mxu0 %v4291_v60  ;;  %1422 = vmatprep.mubr.f32.mxu1 %v4294_v36  ;;  %5042 = vst [vmem:[#allocation45_spill] sm:$0xff] %v4317_v14  ;;  %v1187_v60 = vld [vmem:[%s4939_s1 + $0x410] sm:$0xff] }
  0xce   : > { %1647 = vmatprep.mubr.f32.mxu0 %v4297_v63  ;;  %v1190_v63 = vld [vmem:[%s4939_s1 + $0x428] sm:$0xff] }
  0xd0   : > { %1423 = vmatmul.mubr.f32.gmra.mrb[60].mxu1 %v4271_v57 }
  0xd1   : > { %1648 = vmatmul.mubr.f32.gmra.mrb[60].mxu0 %v4304_v43  ;;  %1427 = vmatprep.mubr.f32.mxu1 %v4307_v22  ;;  %v1188_v43 = vld [vmem:[%s4939_s1 + $0x418] sm:$0xff] }
  0xd2   : > { %1652 = vmatprep.mubr.f32.mxu0 %v4310_v38  ;;  %v2994_v38 = vpack.c.bf16 %v1188_v43, %v1187_v60  ;;  %v5077_v60 = vld [vmem:[#allocation31_spill] sm:$0xff] }
  0xd4   : > { %1428 = vmatmul.mubr.f32.gmra.mrb[62].mxu1 %v4284_v23 }
  0xd5   : > { %1653 = vmatmul.mubr.f32.gmra.mrb[62].mxu0 %v4317_v14  ;;  %1987 = vmatprep.mubr.f32.mxu1 %v3977_v31  ;;  %v1189_v14 = vld [vmem:[%s4939_s1 + $0x420] sm:$0xff] }
  0xd6   : > { %1722 = vmatprep.mubr.f32.mxu0 %v3733_v61  ;;  %v5043_v61 = vmov 0.0|0.0  }
  0xd8   : > { %1988 = vmatmul.mubr.f32.vlgmr.msra.gmra.mrb[64].mxu1 %v3922_v42  ;;  %v1191_v42 = vld [vmem:[%s4939_s1 + $0x430] sm:$0xff] }
  0xd9   : > { %1723 = vmatmul.mubr.f32.vlgmr.msra.gmra.mrb[0].mxu0 %v3712_v53  ;;  %2993 = vmatpush3.bf16.msra.mxu1 %v4113_v13  ;;  %v2998_v53 = vpack.c.bf16 %v1190_v63, %v1189_v14  ;;  %v5064_v63 = vld [vmem:[#allocation17_spill] sm:$0xff]  ;;  %v4474_v13 = vld [vmem:[%s3527_s27 + $0x181] sm:$0xff] }
  0xda   : > { %2944 = vmatpush1.bf16.msra.mxu0 %v3689_v41  ;;  %1727 = vmatprep.mubr.f32.mxu0 %v3760_v7  ;;  %v1192_v41 = vld [vmem:[%s4939_s1 + $0x438] sm:$0xff]  ;;  %v1193_v7 = vld [vmem:[%s4939_s1 + $0x440] sm:$0xff]  ;;  %v5072_v14 = vld [vmem:[#allocation23_spill] sm:$0xff] }
  0xdb   : > { %1992 = vmatprep.mubr.f32.mxu1 %v4006_v47  ;;  %2945 = vmatprep.subr.bf16.mxu0 %v5043_v61 }
  0xdc   : > { %1993 = vmatmul.mubr.f32.gmra.mrb[66].mxu1 %v3951_v21  ;;  %2995 = vmatprep.subr.bf16.mxu1 %v2994_v38  ;;  %v5057_v21 = vld [vmem:[#allocation10_spill] sm:$0xff] }
  0xdd   : > { %1728 = vmatmul.mubr.f32.gmra.mrb[2].mxu0 %v3736_v62  ;;  %1997 = vmatprep.mubr.f32.mxu1 %v4036_v0  ;;  %v3002_v62 = vpack.c.bf16 %v1192_v41, %v1191_v42  ;;  %v2632_v42 = vld [vmem:[%s3527_s27 + $0x3a] sm:$0xff] }
  0xde   : > { %1732 = vmatprep.mubr.f32.mxu0 %v3786_v15  ;;  %2947 = vmatpush1.bf16.msra.mxu0 %v3716_v56  ;;  %v1194_v15 = vld [vmem:[%s4939_s1 + $0x448] sm:$0xff]  ;;  %v5078_v41 = vld [vmem:[#allocation34_spill] sm:$0xff] }
  0xdf   : > { %2997 = vmatpush3.bf16.msra.mxu1 %v2994_v38  ;;  %2948 = vmatprep.subr.bf16.mxu0 %v5043_v61  ;;  %v3006_v56 = vpack.c.bf16 %v1194_v15, %v1193_v7 }
  0xe0   : > { %1998 = vmatmul.mubr.f32.gmra.mrb[68].mxu1 %v3980_v35  ;;  %2999 = vmatprep.subr.bf16.mxu1 %v2998_v53  ;;  %v5060_v35 = vld [vmem:[#allocation16_spill] sm:$0xff] }
  0xe1   : > { %1733 = vmatmul.mubr.f32.gmra.mrb[4].mxu0 %v3763_v8  ;;  %2002 = vmatprep.mubr.f32.mxu1 %v4066_v26  ;;  %v1195_v8 = vld [vmem:[%s4939_s1 + $0x450] sm:$0xff] }
  0xe2   : > { %1737 = vmatprep.mubr.f32.mxu0 %v3812_v24  ;;  %2950 = vmatpush1.bf16.msra.mxu0 %v3741_v1  ;;  %v1196_v24 = vld [vmem:[%s4939_s1 + $0x458] sm:$0xff] }
  0xe3   : > { %2951 = vmatprep.subr.bf16.mxu0 %v5043_v61  ;;  %3001 = vmatpush3.bf16.msra.mxu1 %v2998_v53  ;;  %v3010_v1 = vpack.c.bf16 %v1196_v24, %v1195_v8  ;;  %v5079_v8 = vld [vmem:[#allocation37_spill] sm:$0xff]  ;;  %v2635_v24 = vld [vmem:[%s3527_s27 + $0x62] sm:$0xff] }
  0xe4   : > { %2003 = vmatmul.mubr.f32.gmra.mrb[70].mxu1 %v4009_v50  ;;  %3003 = vmatprep.subr.bf16.mxu1 %v3002_v62  ;;  %v5063_v50 = vld [vmem:[#allocation38_spill] sm:$0xff] }
  0xe5   : > { %1738 = vmatmul.mubr.f32.gmra.mrb[6].mxu0 %v3789_v16  ;;  %2007 = vmatprep.mubr.f32.mxu1 %v4102_v58  ;;  %v1197_v16 = vld [vmem:[%s4939_s1 + $0x460] sm:$0xff] }
  0xe6   : > { %1742 = vmatprep.mubr.f32.mxu0 %v3838_v33  ;;  %2953 = vmatpush1.bf16.msra.mxu0 %v3768_v10  ;;  %v1198_v33 = vld [vmem:[%s4939_s1 + $0x468] sm:$0xff] }
  0xe7   : > { %2954 = vmatprep.subr.bf16.mxu0 %v5043_v61  ;;  %3005 = vmatpush3.bf16.msra.mxu1 %v3002_v62  ;;  %v3014_v10 = vpack.c.bf16 %v1198_v33, %v1197_v16  ;;  %v2633_v62 = vld [vmem:[%s3527_s27 + $0x4a] sm:$0xff] }
  0xe8   : > { %2008 = vmatmul.mubr.f32.gmra.mrb[72].mxu1 %v4039_v6  ;;  %3007 = vmatprep.subr.bf16.mxu1 %v3006_v56  ;;  %v5066_v6 = vld [vmem:[#allocation33_spill] sm:$0xff]  ;;  %v2636_v33 = vld [vmem:[%s3527_s27 + $0x6a] sm:$0xff] }
  0xe9   : > { %1743 = vmatmul.mubr.f32.gmra.mrb[8].mxu0 %v3815_v25  ;;  %2012 = vmatprep.mubr.f32.mxu1 %v4122_v20  ;;  %v1199_v25 = vld [vmem:[%s4939_s1 + $0x470] sm:$0xff] }
  0xea   : > { %1747 = vmatprep.mubr.f32.mxu0 %v3864_v44  ;;  %2956 = vmatpush1.bf16.msra.mxu0 %v3794_v19  ;;  %v1200_v44 = vld [vmem:[%s4939_s1 + $0x478] sm:$0xff] }
  0xeb   : > { %2957 = vmatprep.subr.bf16.mxu0 %v5043_v61  ;;  %3009 = vmatpush3.bf16.msra.mxu1 %v3006_v56  ;;  %v3018_v19 = vpack.c.bf16 %v1200_v44, %v1199_v25  ;;  %v2634_v56 = vld [vmem:[%s3527_s27 + $0x52] sm:$0xff]  ;;  %v2637_v25 = vld [vmem:[%s3527_s27 + $0x7a] sm:$0xff] }
  0xec   : > { %2013 = vmatmul.mubr.f32.gmra.mrb[74].mxu1 %v4069_v29  ;;  %3011 = vmatprep.subr.bf16.mxu1 %v3010_v1  ;;  %v5068_v29 = vld [vmem:[#allocation18_spill] sm:$0xff] }
  0xed   : > { %1748 = vmatmul.mubr.f32.gmra.mrb[10].mxu0 %v3841_v34  ;;  %2017 = vmatprep.mubr.f32.mxu1 %v4138_v39  ;;  %v5045_v34 = vld [vmem:[#allocation6_spill] sm:$0xff] }
  0xee   : > { %1752 = vmatprep.mubr.f32.mxu0 %v3890_v54  ;;  %2959 = vmatpush1.bf16.msra.mxu0 %v3820_v28  ;;  %v5044_v28 = vld [vmem:[#allocation9_spill] sm:$0xff]  ;;  %v5049_v54 = vld [vmem:[#allocation7_spill] sm:$0xff] }
  0xef   : > { %2960 = vmatprep.subr.bf16.mxu0 %v5043_v61  ;;  %3013 = vmatpush3.bf16.msra.mxu1 %v3010_v1 }
  0xf0   : > { %2018 = vmatmul.mubr.f32.gmra.mrb[76].mxu1 %v4105_v2  ;;  %3015 = vmatprep.subr.bf16.mxu1 %v3014_v10  ;;  %v5070_v2 = vld [vmem:[#allocation19_spill] sm:$0xff] }
  0xf1   : > { %1753 = vmatmul.mubr.f32.gmra.mrb[12].mxu0 %v3867_v45  ;;  %2022 = vmatprep.mubr.f32.mxu1 %v4151_v49  ;;  %v5047_v45 = vld [vmem:[#allocation26_spill] sm:$0xff] }
  0xf2   : > { %1757 = vmatprep.mubr.f32.mxu0 %v3916_v4  ;;  %2962 = vmatpush1.bf16.msra.mxu0 %v3846_v37  ;;  %v5046_v37 = vld [vmem:[#allocation20_spill] sm:$0xff]  ;;  %v5052_v4 = vld [vmem:[#allocation13_spill] sm:$0xff] }
  0xf3   : > { %2963 = vmatprep.subr.bf16.mxu0 %v5043_v61  ;;  %3017 = vmatpush3.bf16.msra.mxu1 %v3014_v10  ;;  %v5080_v10 = vld [vmem:[#allocation39_spill] sm:$0xff] }
  0xf4   : > { %2023 = vmatmul.mubr.f32.gmra.mrb[78].mxu1 %v4125_v27  ;;  %3019 = vmatprep.subr.bf16.mxu1 %v3018_v19  ;;  %v2629_v27 = vld [vmem:[%s3527_s27 + $0x199] sm:$0xff] }
  0xf5   : > { %1758 = vmatmul.mubr.f32.gmra.mrb[14].mxu0 %v3893_v55  ;;  %2027 = vmatprep.mubr.f32.mxu1 %v4164_v3  ;;  %v5050_v55 = vld [vmem:[#allocation22_spill] sm:$0xff] }
  0xf6   : > { %1762 = vmatprep.mubr.f32.mxu0 %v3945_v17  ;;  %2965 = vmatpush1.bf16.msra.mxu0 %v3872_v48  ;;  %v5048_v48 = vld [vmem:[#allocation11_spill] sm:$0xff]  ;;  %v5055_v17 = vld [vmem:[#allocation32_spill] sm:$0xff] }
  0xf7   : > { %2966 = vmatprep.subr.bf16.mxu0 %v5043_v61  ;;  %3021 = vmatpush3.bf16.msra.mxu1 %v3018_v19 }
  0xf8   : > { %2028 = vmatmul.mubr.f32.gmra.mrb[80].mxu1 %v4141_v40  ;;  %v5076_v40 = vld [vmem:[#allocation28_spill] sm:$0xff] }
  0xf9   : > { %1763 = vmatmul.mubr.f32.gmra.mrb[16].mxu0 %v3919_v5  ;;  %2032 = vmatprep.mubr.f32.mxu1 %v4177_v32  ;;  %v5053_v5 = vld [vmem:[#allocation8_spill] sm:$0xff] }
  0xfa   : > { %1767 = vmatprep.mubr.f32.mxu0 %v3974_v30  ;;  %2968 = vmatpush1.bf16.msra.mxu0 %v3898_v59  ;;  %v5051_v59 = vld [vmem:[#allocation29_spill] sm:$0xff]  ;;  %v5058_v30 = vld [vmem:[#allocation27_spill] sm:$0xff] }
  0xfb   : > { %2969 = vmatprep.subr.bf16.mxu0 %v5043_v61 }
  0xfc   : > { %2033 = vmatmul.mubr.f32.gmra.mrb[82].mxu1 %v4154_v52  ;;  %v2598_v52 = vld [vmem:[%s3527_s27 + $0x1a0] sm:$0xff] }
  0xfd   : > { %1768 = vmatmul.mubr.f32.gmra.mrb[18].mxu0 %v3948_v18  ;;  %2037 = vmatprep.mubr.f32.mxu1 %v4190_v11  ;;  %v5056_v18 = vld [vmem:[#allocation15_spill] sm:$0xff] }
  0xfe   : > { %1772 = vmatprep.mubr.f32.mxu0 %v4003_v46  ;;  %2971 = vmatpush1.bf16.msra.mxu0 %v3926_v9  ;;  %v5054_v9 = vld [vmem:[#allocation24_spill] sm:$0xff] }
  0xff   : > { %2972 = vmatprep.subr.bf16.mxu0 %v5043_v61  ;;  %v5061_v46 = vld [vmem:[#allocation12_spill] sm:$0xff] }
 0x100   : > { %2038 = vmatmul.mubr.f32.gmra.mrb[84].mxu1 %v4167_v12  ;;  %v5071_v12 = vld [vmem:[#allocation21_spill] sm:$0xff] }
 0x101   : > { %1773 = vmatmul.mubr.f32.gmra.mrb[20].mxu0 %v3977_v31  ;;  %2042 = vmatprep.mubr.f32.mxu1 %v4203_v51  ;;  %v5059_v31 = vld [vmem:[#allocation35_spill] sm:$0xff] }
 0x102   : > { %1777 = vmatprep.mubr.f32.mxu0 %v5044_v28  ;;  %2974 = vmatpush1.bf16.msra.mxu0 %v5045_v34  ;;  %v2638_v28 = vld [vmem:[%s3527_s27 + $0x82] sm:$0xff]  ;;  %v5081_v34 = vld [vmem:[#allocation41_spill] sm:$0xff] }
 0x103   : > { %2975 = vmatprep.subr.bf16.mxu0 %v5043_v61 }
 0x104   : > { %2043 = vmatmul.mubr.f32.gmra.mrb[86].mxu1 %v5046_v37  ;;  %v2639_v37 = vld [vmem:[%s3527_s27 + $0x92] sm:$0xff] }
 0x105   : > { %1778 = vmatmul.mubr.f32.gmra.mrb[22].mxu0 %v4006_v47  ;;  %2047 = vmatprep.mubr.f32.mxu1 %v5047_v45  ;;  %v5062_v47 = vld [vmem:[#allocation30_spill] sm:$0xff] }
 0x106   : > { %1782 = vmatprep.mubr.f32.mxu0 %v5048_v48  ;;  %2977 = vmatpush1.bf16.msra.mxu0 %v5049_v54  ;;  %v2640_v54 = vld [vmem:[%s3527_s27 + $0x9a] sm:$0xff] }
 0x107   : > { %2978 = vmatprep.subr.bf16.mxu0 %v5043_v61 }
 0x108   : > { %2048 = vmatmul.mubr.f32.gmra.mrb[88].mxu1 %v5050_v55  ;;  %v5082_v55 = vld [vmem:[#allocation43_spill] sm:$0xff] }
 0x109   : > { %1783 = vmatmul.mubr.f32.gmra.mrb[24].mxu0 %v4036_v0  ;;  %2052 = vmatprep.mubr.f32.mxu1 %v5051_v59  ;;  %v5065_v0 = vld [vmem:[#allocation14_spill] sm:$0xff] }
 0x10a   : > { %1787 = vmatprep.mubr.f32.mxu0 %v5052_v4  ;;  %2980 = vmatpush1.bf16.msra.mxu0 %v5053_v5 }
 0x10b   : > { %2981 = vmatprep.subr.bf16.mxu0 %v5043_v61 }
 0x10c   : > { %2053 = vmatmul.mubr.f32.gmra.mrb[90].mxu1 %v5054_v9  ;;  %v2642_v9 = vld [vmem:[%s3527_s27 + $0xb2] sm:$0xff] }
 0x10d   : > { %1788 = vmatmul.mubr.f32.gmra.mrb[26].mxu0 %v4066_v26  ;;  %2057 = vmatprep.mubr.f32.mxu1 %v5055_v17  ;;  %v5067_v26 = vld [vmem:[#allocation40_spill] sm:$0xff] }
 0x10e   : > { %1792 = vmatprep.mubr.f32.mxu0 %v5056_v18  ;;  %2983 = vmatpush1.bf16.msra.mxu0 %v5057_v21  ;;  %v2643_v18 = vld [vmem:[%s3527_s27 + $0xc2] sm:$0xff] }
 0x10f   : > { %2984 = vmatprep.subr.bf16.mxu0 %v5043_v61 }
 0x110   : > { %2058 = vmatmul.mubr.f32.gmra.mrb[92].mxu1 %v5058_v30  ;;  %v4540_v30 = vld [vmem:[%s3527_s27 + $0x182] sm:$0xff] }
 0x111   : > { %1793 = vmatmul.mubr.f32.gmra.mrb[28].mxu0 %v4102_v58  ;;  %2062 = vmatprep.mubr.f32.mxu1 %v5059_v31  ;;  %v5069_v58 = vld [vmem:[#allocation36_spill] sm:$0xff] }
 0x112   : > { %1797 = vmatprep.mubr.f32.mxu0 %v5060_v35  ;;  %2986 = vmatpush1.bf16.msra.mxu0 %v5061_v46  ;;  %v2644_v35 = vld [vmem:[%s3527_s27 + $0xca] sm:$0xff] }
 0x113   : > { %2987 = vmatprep.subr.bf16.mxu0 %v5043_v61  ;;  %v2631_v61 = vld [vmem:[%s3527_s27 + $0x32] sm:$0xff] }
 0x114   : > { %2063 = vmatmul.mubr.f32.gmra.mrb[94].mxu1 %v5062_v47  ;;  %v4549_v47 = vld [vmem:[%s3527_s27 + $0x18a] sm:$0xff] }
 0x115   : > { %1798 = vmatmul.mubr.f32.gmra.mrb[30].mxu0 %v4122_v20  ;;  %2067 = vmatprep.mubr.f32.mxu1 %v5063_v50  ;;  %v4481_v20 = vld [vmem:[%s3527_s27 + $0x189] sm:$0xff] }
 0x116   : > { %1802 = vmatprep.mubr.f32.mxu0 %v5064_v63  ;;  %2989 = vmatpush1.bf16.msra.mxu0 %v5065_v0  ;;  %v2646_v63 = vld [vmem:[%s3527_s27 + $0xe2] sm:$0xff] }
 0x118   : > { %2068 = vmatmul.mubr.f32.gmra.mrb[96].mxu1 %v5066_v6  ;;  %v2599_v6 = vld [vmem:[%s3527_s27 + $0x31] sm:$0xff] }
 0x119   : > { %1803 = vmatmul.mubr.f32.gmra.mrb[32].mxu0 %v4138_v39  ;;  %2072 = vmatprep.mubr.f32.mxu1 %v5067_v26  ;;  %v2597_v39 = vld [vmem:[%s3527_s27 + $0x198] sm:$0xff] }
 0x11a   : > { %1807 = vmatprep.mubr.f32.mxu0 %v5068_v29  ;;  %v2567_v29 = vld [vmem:[%s3527_s27 + $0x30] sm:$0xff] }
 0x11c   : > { %2073 = vmatmul.mubr.f32.gmra.mrb[98].mxu1 %v5069_v58 }
 0x11d   : > { %1808 = vmatmul.mubr.f32.gmra.mrb[34].mxu0 %v4151_v49  ;;  %2077 = vmatprep.mubr.f32.mxu1 %v4294_v36 }
 0x11e   : > { %1812 = vmatprep.mubr.f32.mxu0 %v5070_v2  ;;  %v2600_v2 = vld [vmem:[%s3527_s27 + $0x39] sm:$0xff] }
 0x120   : > { %2078 = vmatmul.mubr.f32.gmra.mrb[100].mxu1 %v4271_v57  ;;  %v5073_v57 = vld [vmem:[#allocation42_spill] sm:$0xff] }
 0x121   : > { %1813 = vmatmul.mubr.f32.gmra.mrb[36].mxu0 %v4164_v3  ;;  %2082 = vmatprep.mubr.f32.mxu1 %v4307_v22  ;;  %v5074_v3 = vld [vmem:[#allocation25_spill] sm:$0xff] }
 0x122   : > { %1817 = vmatprep.mubr.f32.mxu0 %v5071_v12 }
 0x124   : > { %2083 = vmatmul.mubr.f32.gmra.mrb[102].mxu1 %v4284_v23 }
 0x125   : > { %1818 = vmatmul.mubr.f32.gmra.mrb[38].mxu0 %v4177_v32  ;;  %2087 = vmatprep.mubr.f32.mxu1 %v4474_v13  ;;  %v5075_v32 = vld [vmem:[#allocation44_spill] sm:$0xff] }
 0x126   : > { %1822 = vmatprep.mubr.f32.mxu0 %v5072_v14 }
 0x128   : > { %2088 = vmatmul.mubr.f32.gmra.mrb[104].mxu1 %v5073_v57  ;;  %v2568_v57 = vld [vmem:[%s3527_s27 + $0x38] sm:$0xff] }
 0x129   : > { %1823 = vmatmul.mubr.f32.gmra.mrb[40].mxu0 %v4190_v11  ;;  %2092 = vmatprep.mubr.f32.mxu1 %v4481_v20  ;;  %v2630_v11 = vld [vmem:[%s3527_s27 + $0x1a1] sm:$0xff] }
 0x12a   : > { %1827 = vmatprep.mubr.f32.mxu0 %v5074_v3 }
 0x12b   : > { %v4488_v23 = vpop.f32.mrb[0].mxu1 }
 0x12c   : > { %2093 = vmatmul.mubr.f32.gmra.mrb[106].mxu1 %v5075_v32  ;;  %v1276_v38 = vpop.f32.mrb[1].mxu1 }
 0x12d   : > { %1828 = vmatmul.mubr.f32.gmra.mrb[42].mxu0 %v4203_v51  ;;  %2097 = vmatprep.mubr.f32.mxu1 %v2629_v27  ;;  %v2569_v38 = vld [vmem:[%s3527_s27 + $0x48] sm:$0xff] }
 0x12e   : > { %1832 = vmatprep.mubr.f32.mxu0 %v5076_v40 }
 0x12f   : > { %v4495_v43 = vpop.f32.mrb[2].mxu1 }
 0x130   : > { %2098 = vmatmul.mubr.f32.gmra.mrb[108].mxu1 %v2597_v39  ;;  %v1281_v49 = vpop.f32.mrb[3].mxu1  ;;  %v2602_v39 = vld [vmem:[%s3527_s27 + $0x51] sm:$0xff] }
 0x131   : > { %1833 = vmatmul.mubr.f32.gmra.mrb[44].mxu0 %v5047_v45  ;;  %2102 = vmatprep.mubr.f32.mxu1 %v2630_v11  ;;  %v2570_v11 = vld [vmem:[%s3527_s27 + $0x50] sm:$0xff]  ;;  %v2603_v49 = vld [vmem:[%s3527_s27 + $0x61] sm:$0xff] }
 0x132   : > { %1837 = vmatprep.mubr.f32.mxu0 %v5077_v60 }
 0x133   : > { %v4501_v51 = vpop.f32.mrb[4].mxu1 }
 0x134   : > { %2103 = vmatmul.mubr.f32.gmra.mrb[110].mxu1 %v2598_v52  ;;  %v1286_v53 = vpop.f32.mrb[5].mxu1  ;;  %v2571_v52 = vld [vmem:[%s3527_s27 + $0x60] sm:$0xff] }
 0x135   : > { %1838 = vmatmul.mubr.f32.gmra.mrb[46].mxu0 %v5051_v59  ;;  %2750 = vmatprep.mubr.f32.mxu1 %v2631_v61  ;;  %v2641_v59 = vld [vmem:[%s3527_s27 + $0xaa] sm:$0xff] }
 0x136   : > { %1842 = vmatprep.mubr.f32.mxu0 %v5078_v41  ;;  %v2604_v61 = vld [vmem:[%s3527_s27 + $0x69] sm:$0xff] }
 0x137   : > { %v4507_v7 = vpop.f32.mrb[6].mxu1 }
 0x138   : > { %2751 = vmatmul.mubr.f32.vlgmr.msra.gmra.mrb[112].mxu1 %v2632_v42  ;;  %v1291_v15 = vpop.f32.mrb[7].mxu1  ;;  %v2572_v42 = vld [vmem:[%s3527_s27 + $0x68] sm:$0xff] }
 0x139   : > { %1843 = vmatmul.mubr.f32.gmra.mrb[48].mxu0 %v5055_v17  ;;  %2753 = vmatprep.mubr.f32.mxu1 %v2633_v62  ;;  %v5083_v17 = vld [vmem:[#allocation45_spill] sm:$0xff] }
 0x13a   : > { %1847 = vmatprep.mubr.f32.mxu0 %v5079_v8  ;;  %v2605_v62 = vld [vmem:[%s3527_s27 + $0x79] sm:$0xff] }
 0x13b   : > { %v4513_v1 = vpop.f32.mrb[8].mxu1 }
 0x13c   : > { %2754 = vmatmul.mubr.f32.gmra.mrb[114].mxu1 %v2634_v56  ;;  %v1296_v16 = vpop.f32.mrb[9].mxu1  ;;  %v2573_v56 = vld [vmem:[%s3527_s27 + $0x78] sm:$0xff] }
 0x13d   : > { %1848 = vmatmul.mubr.f32.gmra.mrb[50].mxu0 %v5059_v31  ;;  %2756 = vmatprep.mubr.f32.mxu1 %v2635_v24  ;;  %v2606_v16 = vld [vmem:[%s3527_s27 + $0x81] sm:$0xff] }
 0x13e   : > { %1852 = vmatprep.mubr.f32.mxu0 %v5080_v10 }
 0x13f   : > { %v4519_v44 = vpop.f32.mrb[10].mxu1 }
 0x140   : > { %2757 = vmatmul.mubr.f32.gmra.mrb[116].mxu1 %v2636_v33  ;;  %v1301_v19 = vpop.f32.mrb[11].mxu1 }
 0x141   : > { %1853 = vmatmul.mubr.f32.gmra.mrb[52].mxu0 %v5063_v50  ;;  %2759 = vmatprep.mubr.f32.mxu1 %v2637_v25  ;;  %v2574_v25 = vld [vmem:[%s3527_s27 + $0x80] sm:$0xff] }
 0x142   : > { %1857 = vmatprep.mubr.f32.mxu0 %v5081_v34 }
 0x143   : > { %v4525_v45 = vpop.f32.mrb[12].mxu1 }
 0x144   : > { %2760 = vmatmul.mubr.f32.gmra.mrb[118].mxu1 %v2638_v28  ;;  %v1306_v48 = vpop.f32.mrb[13].mxu1 }
 0x145   : > { %1858 = vmatmul.mubr.f32.gmra.mrb[54].mxu0 %v5067_v26  ;;  %2762 = vmatprep.mubr.f32.mxu1 %v2639_v37 }
 0x146   : > { %1862 = vmatprep.mubr.f32.mxu0 %v5082_v55 }
 0x147   : > { %v4531_v4 = vpop.f32.mrb[14].mxu1 }
 0x148   : > { %2763 = vmatmul.mubr.f32.gmra.mrb[120].mxu1 %v2640_v54  ;;  %v1311_v5 = vpop.f32.mrb[15].mxu1 }
 0x149   : > { %1863 = vmatmul.mubr.f32.gmra.mrb[56].mxu0 %v4294_v36  ;;  %2765 = vmatprep.mubr.f32.mxu1 %v2641_v59  ;;  %v2645_v36 = vld [vmem:[%s3527_s27 + $0xda] sm:$0xff] }
 0x14a   : > { %1867 = vmatprep.mubr.f32.mxu0 %v5083_v17 }
 0x14b   : > { %v4537_v21 = vpop.f32.mrb[16].mxu1 }
 0x14c   : > { %2766 = vmatmul.mubr.f32.gmra.mrb[122].mxu1 %v2642_v9  ;;  %v1316_v31 = vpop.f32.mrb[17].mxu1 }
 0x14d   : > { %1868 = vmatmul.mubr.f32.gmra.mrb[58].mxu0 %v4307_v22  ;;  %2768 = vmatprep.mubr.f32.mxu1 %v2643_v18  ;;  %v2647_v22 = vld [vmem:[%s3527_s27 + $0xf2] sm:$0xff] }
 0x14e   : > { %1872 = vmatprep.mubr.f32.mxu0 %v4540_v30 }
 0x14f   : > { %v4546_v46 = vpop.f32.mrb[18].mxu1 }
 0x150   : > { %2769 = vmatmul.mubr.f32.gmra.mrb[124].mxu1 %v2644_v35  ;;  %v1321_v50 = vpop.f32.mrb[19].mxu1 }
 0x151   : > { %1873 = vmatmul.mubr.f32.gmra.mrb[60].mxu0 %v4474_v13  ;;  %2771 = vmatprep.mubr.f32.mxu1 %v2645_v36 }
 0x152   : > { %1877 = vmatprep.mubr.f32.mxu0 %v4549_v47 }
 0x153   : > { %v4555_v0 = vpop.f32.mrb[20].mxu1 }
 0x154   : > { %2772 = vmatmul.mubr.f32.gmra.mrb[126].mxu1 %v2646_v63  ;;  %v1326_v26 = vpop.f32.mrb[21].mxu1 }
 0x155   : > { %1878 = vmatmul.mubr.f32.gmra.mrb[62].mxu0 %v4481_v20  ;;  %2774 = vmatprep.mubr.f32.mxu1 %v2647_v22  ;;  %v2601_v20 = vld [vmem:[%s3527_s27 + $0x49] sm:$0xff] }
 0x156   : > { %1947 = vmatprep.mubr.f32.mxu0 %v2599_v6 }
 0x157   : > { %v4560_v58 = vpop.f32.mrb[22].mxu1 }
 0x158   : > { %2775 = vmatmul.mubr.f32.gmra.mrb[128].mxu1 %v5071_v12  ;;  %v1331_v13 = vpop.f32.mrb[23].mxu1 }
 0x159   : > { %1948 = vmatmul.mubr.f32.vlgmr.msra.gmra.mrb[0].mxu0 %v2567_v29  ;;  %2777 = vmatprep.mubr.f32.mxu1 %v5072_v14 }
 0x15a   : > { %1952 = vmatprep.mubr.f32.mxu0 %v2600_v2 }
 0x15b   : > { %v4566_v27 = vpop.f32.mrb[24].mxu1 }
 0x15c   : > { %2778 = vmatmul.mubr.f32.gmra.mrb[130].mxu1 %v5074_v3  ;;  %v1336_v32 = vpop.f32.mrb[25].mxu1 }
 0x15d   : > { %1953 = vmatmul.mubr.f32.gmra.mrb[2].mxu0 %v2568_v57  ;;  %2780 = vmatprep.mubr.f32.mxu1 %v5076_v40 }
 0x15e   : > { %1957 = vmatprep.mubr.f32.mxu0 %v2601_v20 }
 0x15f   : > { %v4572_v12 = vpop.f32.mrb[26].mxu1 }
 0x160   : > { %2781 = vmatmul.mubr.f32.gmra.mrb[132].mxu1 %v5077_v60  ;;  %v1341_v14 = vpop.f32.mrb[27].mxu1 }
 0x161   : > { %1958 = vmatmul.mubr.f32.gmra.mrb[4].mxu0 %v2569_v38  ;;  %2783 = vmatprep.mubr.f32.mxu1 %v5078_v41 }
 0x162   : > { %1962 = vmatprep.mubr.f32.mxu0 %v2602_v39 }
 0x163   : > { %v4578_v3 = vpop.f32.mrb[28].mxu1 }
 0x164   : > { %2784 = vmatmul.mubr.f32.gmra.mrb[134].mxu1 %v5079_v8  ;;  %v1346_v40 = vpop.f32.mrb[29].mxu1  ;;  %v2661_v8 = vld [vmem:[%s3527_s27 + $0x19a] sm:$0xff] }
 0x165   : > { %1963 = vmatmul.mubr.f32.gmra.mrb[6].mxu0 %v2570_v11  ;;  %2786 = vmatprep.mubr.f32.mxu1 %v5080_v10  ;;  %v2662_v10 = vld [vmem:[%s3527_s27 + $0x1a2] sm:$0xff] }
 0x166   : > { %1967 = vmatprep.mubr.f32.mxu0 %v2603_v49 }
 0x167   : > { %v4584_v60 = vpop.f32.mrb[30].mxu1 }
 0x168   : > { %2787 = vmatmul.mubr.f32.gmra.mrb[136].mxu1 %v5081_v34  ;;  %v1351_v53 = vpop.f32.mrb[31].mxu1 }
 0x169   : > { %1968 = vmatmul.mubr.f32.gmra.mrb[8].mxu0 %v2571_v52  ;;  %2789 = vmatprep.mubr.f32.mxu1 %v5082_v55 }
 0x16a   : > { %1972 = vmatprep.mubr.f32.mxu0 %v2604_v61 }
 0x16b   : > { %v4590_v41 = vpop.f32.mrb[32].mxu1 }
 0x16c   : > { %2790 = vmatmul.mubr.f32.gmra.mrb[138].mxu1 %v5083_v17  ;;  %v1356_v15 = vpop.f32.mrb[33].mxu1 }
 0x16d   : > { %1973 = vmatmul.mubr.f32.gmra.mrb[10].mxu0 %v2572_v42  ;;  %2792 = vmatprep.mubr.f32.mxu1 %v4540_v30 }
 0x16e   : > { %1977 = vmatprep.mubr.f32.mxu0 %v2605_v62 }
 0x16f   : > { %v4597_v24 = vpop.f32.mrb[34].mxu1 }
 0x170   : > { %2793 = vmatmul.mubr.f32.gmra.mrb[140].mxu1 %v4549_v47  ;;  %v1361_v33 = vpop.f32.mrb[35].mxu1 }
 0x171   : > { %1978 = vmatmul.mubr.f32.gmra.mrb[12].mxu0 %v2573_v56  ;;  %2795 = vmatprep.mubr.f32.mxu1 %v2661_v8 }
 0x172   : > { %1982 = vmatprep.mubr.f32.mxu0 %v2606_v16 }
 0x173   : > { %v4603_v19 = vpop.f32.mrb[36].mxu1 }
 0x174   : > { %2796 = vmatmul.mubr.f32.gmra.mrb[142].mxu1 %v2662_v10  ;;  %v1366_v28 = vpop.f32.mrb[37].mxu1  ;;  %v4634_v10 = vld [vmem:[%s4940_s2] ss:$0 sm:$0xff] }
 0x175   : > { %1983 = vmatmul.mubr.f32.gmra.mrb[14].mxu0 %v2574_v25  ;;  %v1315_v25 = vadd.f32 %v4634_v10, %v4537_v21  ;;  %v1325_v21 = vadd.f32 %v4634_v10, %v4555_v0  ;;  %v1335_v0 = vadd.f32 %v4634_v10, %v4566_v27  ;;  %v1345_v27 = vadd.f32 %v4634_v10, %v4578_v3 }
 0x176   : > { %v1355_v3 = vadd.f32 %v4634_v10, %v4590_v41 }
 0x177   : > { %v4605_v34 = vpop.f32.mrb[38].mxu1 }
 0x178   : > { %v1371_v37 = vpop.f32.mrb[39].mxu1 }
 0x17b   : > { %v4607_v48 = vpop.f32.mrb[40].mxu1 }
 0x17c   : > { %v1376_v54 = vpop.f32.mrb[41].mxu1 }
 0x17f   : > { %v4609_v55 = vpop.f32.mrb[42].mxu1 }
 0x180   : > { %v1381_v59 = vpop.f32.mrb[43].mxu1 }
 0x183   : > { %v4611_v5 = vpop.f32.mrb[44].mxu1 }
 0x184   : > { %v1386_v9 = vpop.f32.mrb[45].mxu1 }
 0x187   : > { %v4613_v17 = vpop.f32.mrb[46].mxu1 }
 0x188   : > { %v1391_v18 = vpop.f32.mrb[47].mxu1 }
 0x189   : > { %v1320_v18 = vadd.f32 %v4634_v10, %v4546_v46  ;;  %v1330_v46 = vadd.f32 %v4634_v10, %v4560_v58  ;;  %v1340_v58 = vadd.f32 %v4634_v10, %v4572_v12  ;;  %v1350_v12 = vadd.f32 %v4634_v10, %v4584_v60 }
 0x18a   : > { %v1360_v60 = vadd.f32 %v4634_v10, %v4597_v24 }
 0x18b   : > { %v4615_v30 = vpop.f32.mrb[48].mxu1 }
 0x18c   : > { %v1396_v31 = vpop.f32.mrb[49].mxu1 }
 0x18f   : > { %v4617_v35 = vpop.f32.mrb[50].mxu1 }
 0x190   : > { %v1401_v36 = vpop.f32.mrb[51].mxu1 }
 0x193   : > { %v4619_v47 = vpop.f32.mrb[52].mxu1 }
 0x194   : > { %v1406_v50 = vpop.f32.mrb[53].mxu1 }
 0x197   : > { %v4621_v63 = vpop.f32.mrb[54].mxu1 }
 0x198   : > { %v1411_v22 = vpop.f32.mrb[55].mxu1 }
 0x19b   : > { %v4623_v6 = vpop.f32.mrb[56].mxu1 }
 0x19c   : > { %v1416_v26 = vpop.f32.mrb[57].mxu1 }
 0x19f   : > { %v4625_v29 = vpop.f32.mrb[58].mxu1 }
 0x1a0   : > { %v1421_v2 = vpop.f32.mrb[59].mxu1 }
 0x1a3   : > { %v4627_v13 = vpop.f32.mrb[60].mxu1 }
 0x1a4   : > { %v1426_v57 = vpop.f32.mrb[61].mxu1 }
 0x1a7   : > { %v4629_v20 = vpop.f32.mrb[62].mxu1 }
 0x1a8   : > { %v1431_v32 = vpop.f32.mrb[63].mxu1 }
 0x1ab   : > { %v1989_v38 = vpop.f32.mrb[64].mxu1 }
 0x1ac   : > { %v1991_v39 = vpop.f32.mrb[65].mxu1 }
 0x1af   : > { %v1994_v14 = vpop.f32.mrb[66].mxu1 }
 0x1b0   : > { %v1996_v11 = vpop.f32.mrb[67].mxu1 }
 0x1b3   : > { %v1999_v49 = vpop.f32.mrb[68].mxu1 }
 0x1b4   : > { %v2001_v40 = vpop.f32.mrb[69].mxu1 }
 0x1b7   : > { %v2004_v52 = vpop.f32.mrb[70].mxu1 }
 0x1b8   : > { %v2006_v61 = vpop.f32.mrb[71].mxu1 }
 0x1bb   : > { %v2009_v53 = vpop.f32.mrb[72].mxu1 }
 0x1bc   : > { %v2011_v42 = vpop.f32.mrb[73].mxu1 }
 0x1bf   : > { %v2014_v62 = vpop.f32.mrb[74].mxu1 }
 0x1c0   : > { %v2016_v15 = vpop.f32.mrb[75].mxu1 }
 0x1c3   : > { %v2019_v56 = vpop.f32.mrb[76].mxu1 }
 0x1c4   : > { %v2021_v8 = vpop.f32.mrb[77].mxu1 }
 0x1c7   : > { %v2024_v16 = vpop.f32.mrb[78].mxu1 }
 0x1c8   : > { %v2026_v33 = vpop.f32.mrb[79].mxu1 }
 0x1cb   : > { %v4638_v28 = vpop.f32.mrb[80].mxu1 }
 0x1cc   : > { %v1764_v37 = vpop.f32.mrb[16].mxu0  ;;  %v2031_v54 = vpop.f32.mrb[81].mxu1 }
 0x1cd   : > { %v3071_v59 = vadd.f32 %v1764_v37, %v1315_v25  ;;  %v1766_v9 = vpop.f32.mrb[17].mxu0 }
 0x1cf   : > { %v4642_v31 = vpop.f32.mrb[82].mxu1  ;;  %v4644_v36 = vadd.f32 %v3071_v59, %v1989_v38 }
 0x1d0   : > { %v1769_v50 = vpop.f32.mrb[18].mxu0  ;;  %v2036_v22 = vpop.f32.mrb[83].mxu1 }
 0x1d1   : > { %v3074_v26 = vadd.f32 %v1769_v50, %v1320_v18  ;;  %v1771_v2 = vpop.f32.mrb[19].mxu0 }
 0x1d3   : > { %v4648_v57 = vpop.f32.mrb[84].mxu1  ;;  %v4650_v32 = vadd.f32 %v3074_v26, %v1994_v14 }
 0x1d4   : > { %v1774_v39 = vpop.f32.mrb[20].mxu0  ;;  %v2041_v11 = vpop.f32.mrb[85].mxu1 }
 0x1d5   : > { %v3077_v40 = vadd.f32 %v1774_v39, %v1325_v21  ;;  %v1776_v61 = vpop.f32.mrb[21].mxu0 }
 0x1d7   : > { %v4654_v38 = vpop.f32.mrb[86].mxu1  ;;  %v4656_v42 = vadd.f32 %v3077_v40, %v1999_v49 }
 0x1d8   : > { %v1779_v15 = vpop.f32.mrb[22].mxu0  ;;  %v2046_v8 = vpop.f32.mrb[87].mxu1 }
 0x1d9   : > { %v3080_v33 = vadd.f32 %v1779_v15, %v1330_v46  ;;  %v1781_v25 = vpop.f32.mrb[23].mxu0 }
 0x1db   : > { %v4660_v14 = vpop.f32.mrb[88].mxu1  ;;  %v4662_v37 = vadd.f32 %v3080_v33, %v2004_v52 }
 0x1dc   : > { %v1784_v54 = vpop.f32.mrb[24].mxu0  ;;  %v2051_v59 = vpop.f32.mrb[89].mxu1 }
 0x1dd   : > { %v3083_v9 = vadd.f32 %v1784_v54, %v1335_v0  ;;  %v1786_v18 = vpop.f32.mrb[25].mxu0 }
 0x1df   : > { %v4666_v49 = vpop.f32.mrb[90].mxu1  ;;  %v4668_v50 = vadd.f32 %v3083_v9, %v2009_v53 }
 0x1e0   : > { %v1789_v22 = vpop.f32.mrb[26].mxu0  ;;  %v2056_v26 = vpop.f32.mrb[91].mxu1 }
 0x1e1   : > { %v3086_v2 = vadd.f32 %v1789_v22, %v1340_v58  ;;  %v1791_v21 = vpop.f32.mrb[27].mxu0 }
 0x1e3   : > { %v4672_v52 = vpop.f32.mrb[92].mxu1  ;;  %v4674_v39 = vadd.f32 %v3086_v2, %v2014_v62 }
 0x1e4   : > { %v1794_v11 = vpop.f32.mrb[28].mxu0  ;;  %v2061_v40 = vpop.f32.mrb[93].mxu1 }
 0x1e5   : > { %v3089_v61 = vadd.f32 %v1794_v11, %v1345_v27  ;;  %v1796_v46 = vpop.f32.mrb[29].mxu0 }
 0x1e7   : > { %v4678_v53 = vpop.f32.mrb[94].mxu1  ;;  %v4680_v15 = vadd.f32 %v3089_v61, %v2019_v56 }
 0x1e8   : > { %v1799_v8 = vpop.f32.mrb[30].mxu0  ;;  %v2066_v33 = vpop.f32.mrb[95].mxu1 }
 0x1e9   : > { %v3092_v25 = vadd.f32 %v1799_v8, %v1350_v12  ;;  %v1801_v0 = vpop.f32.mrb[31].mxu0 }
 0x1eb   : > { %v4684_v62 = vpop.f32.mrb[96].mxu1  ;;  %v4686_v54 = vadd.f32 %v3092_v25, %v2024_v16  ;;  %v1365_v16 = vadd.f32 %v4634_v10, %v4603_v19 }
 0x1ec   : > { %v1804_v59 = vpop.f32.mrb[32].mxu0  ;;  %v2071_v9 = vpop.f32.mrb[97].mxu1 }
 0x1ed   : > { %v3095_v18 = vadd.f32 %v1804_v59, %v1355_v3  ;;  %v1806_v58 = vpop.f32.mrb[33].mxu0 }
 0x1ef   : > { %v4690_v56 = vpop.f32.mrb[98].mxu1  ;;  %v4693_v22 = vadd.f32 %v3095_v18, %v4638_v28  ;;  %v1370_v28 = vadd.f32 %v4634_v10, %v4605_v34 }
 0x1f0   : > { %v1809_v26 = vpop.f32.mrb[34].mxu0  ;;  %v2076_v2 = vpop.f32.mrb[99].mxu1 }
 0x1f1   : > { %v3098_v21 = vadd.f32 %v1809_v26, %v1360_v60  ;;  %v1811_v41 = vpop.f32.mrb[35].mxu0 }
 0x1f3   : > { %v4697_v27 = vpop.f32.mrb[100].mxu1  ;;  %v4700_v11 = vadd.f32 %v3098_v21, %v4642_v31  ;;  %v1375_v31 = vadd.f32 %v4634_v10, %v4607_v48 }
 0x1f4   : > { %v1814_v40 = vpop.f32.mrb[36].mxu0  ;;  %v2081_v61 = vpop.f32.mrb[101].mxu1 }
 0x1f5   : > { %v3101_v24 = vadd.f32 %v1814_v40, %v1365_v16  ;;  %v1816_v46 = vpop.f32.mrb[37].mxu0 }
 0x1f7   : > { %v4704_v12 = vpop.f32.mrb[102].mxu1  ;;  %v4707_v8 = vadd.f32 %v3101_v24, %v4648_v57  ;;  %v1380_v57 = vadd.f32 %v4634_v10, %v4609_v55 }
 0x1f8   : > { %v1819_v33 = vpop.f32.mrb[38].mxu0  ;;  %v2086_v25 = vpop.f32.mrb[103].mxu1 }
 0x1f9   : > { %v3104_v19 = vadd.f32 %v1819_v33, %v1370_v28  ;;  %v1821_v0 = vpop.f32.mrb[39].mxu0 }
 0x1fb   : > { %v4711_v3 = vpop.f32.mrb[104].mxu1  ;;  %v4714_v59 = vadd.f32 %v3104_v19, %v4654_v38  ;;  %v1385_v38 = vadd.f32 %v4634_v10, %v4611_v5 }
 0x1fc   : > { %v1824_v9 = vpop.f32.mrb[40].mxu0  ;;  %v2091_v18 = vpop.f32.mrb[105].mxu1 }
 0x1fd   : > { %v3107_v34 = vadd.f32 %v1824_v9, %v1375_v31  ;;  %v1826_v58 = vpop.f32.mrb[41].mxu0 }
 0x1ff   : > { %v4718_v60 = vpop.f32.mrb[106].mxu1  ;;  %v4721_v26 = vadd.f32 %v3107_v34, %v4660_v14  ;;  %v1390_v14 = vadd.f32 %v4634_v10, %v4613_v17 }
 0x200   : > { %v1829_v2 = vpop.f32.mrb[42].mxu0  ;;  %v2096_v21 = vpop.f32.mrb[107].mxu1 }
 0x201   : > { %v3110_v48 = vadd.f32 %v1829_v2, %v1380_v57  ;;  %v1831_v41 = vpop.f32.mrb[43].mxu0 }
 0x202   : > { %v1405_v41 = vadd.f32 %v4634_v10, %v4619_v47 }
 0x203   : > { %v4725_v16 = vpop.f32.mrb[108].mxu1  ;;  %v4728_v40 = vadd.f32 %v3110_v48, %v4666_v49  ;;  %v1395_v49 = vadd.f32 %v4634_v10, %v4615_v30 }
 0x204   : > { %v1834_v61 = vpop.f32.mrb[44].mxu0  ;;  %v2101_v24 = vpop.f32.mrb[109].mxu1 }
 0x205   : > { %v3113_v55 = vadd.f32 %v1834_v61, %v1385_v38  ;;  %v1836_v46 = vpop.f32.mrb[45].mxu0 }
 0x206   : > { %v1410_v46 = vadd.f32 %v4634_v10, %v4621_v63 }
 0x207   : > { %v4732_v28 = vpop.f32.mrb[110].mxu1  ;;  %v4735_v33 = vadd.f32 %v3113_v55, %v4672_v52  ;;  %v1400_v52 = vadd.f32 %v4634_v10, %v4617_v35 }
 0x208   : > { %v1839_v25 = vpop.f32.mrb[46].mxu0  ;;  %v2106_v19 = vpop.f32.mrb[111].mxu1 }
 0x209   : > { %v3116_v5 = vadd.f32 %v1839_v25, %v1390_v14  ;;  %v1841_v0 = vpop.f32.mrb[47].mxu0 }
 0x20a   : > { %v1415_v0 = vadd.f32 %v4634_v10, %v4623_v6  ;;  %v1420_v6 = vadd.f32 %v4634_v10, %v4625_v29 }
 0x20b   : > { %v4739_v31 = vpop.f32.mrb[112].mxu1  ;;  %v4742_v9 = vadd.f32 %v3116_v5, %v4678_v53 }
 0x20c   : > { %v1844_v18 = vpop.f32.mrb[48].mxu0  ;;  %v4744_v34 = vpop.f32.mrb[113].mxu1 }
 0x20d   : > { %v3119_v17 = vadd.f32 %v1844_v18, %v1395_v49  ;;  %v1846_v58 = vpop.f32.mrb[49].mxu0 }
 0x20f   : > { %v4748_v57 = vpop.f32.mrb[114].mxu1  ;;  %v4751_v2 = vadd.f32 %v3119_v17, %v4684_v62 }
 0x210   : > { %v1849_v30 = vpop.f32.mrb[50].mxu0  ;;  %v4753_v21 = vpop.f32.mrb[115].mxu1 }
 0x211   : > { %v3122_v53 = vadd.f32 %v1849_v30, %v1400_v52  ;;  %v1851_v48 = vpop.f32.mrb[51].mxu0 }
 0x213   : > { %v4757_v38 = vpop.f32.mrb[116].mxu1  ;;  %v4760_v61 = vadd.f32 %v3122_v53, %v4690_v56 }
 0x214   : > { %v1854_v35 = vpop.f32.mrb[52].mxu0  ;;  %v4762_v24 = vpop.f32.mrb[117].mxu1 }
 0x215   : > { %v3125_v55 = vadd.f32 %v1854_v35, %v1405_v41  ;;  %v1856_v62 = vpop.f32.mrb[53].mxu0 }
 0x216   : > { %v1425_v62 = vadd.f32 %v4634_v10, %v4627_v13 }
 0x217   : > { %v4767_v14 = vpop.f32.mrb[118].mxu1  ;;  %v4770_v25 = vadd.f32 %v3125_v55, %v4697_v27 }
 0x218   : > { %v1859_v47 = vpop.f32.mrb[54].mxu0  ;;  %v4772_v19 = vpop.f32.mrb[119].mxu1 }
 0x219   : > { %v3128_v56 = vadd.f32 %v1859_v47, %v1410_v46  ;;  %v1861_v5 = vpop.f32.mrb[55].mxu0 }
 0x21b   : > { %v2764_v49 = vpop.f32.mrb[120].mxu1  ;;  %v4779_v18 = vadd.f32 %v3128_v56, %v4704_v12 }
 0x21c   : > { %v1864_v63 = vpop.f32.mrb[56].mxu0  ;;  %v2220_v17 = vadd.f32 %v4650_v32, %v2764_v49  ;;  %v2214_v58 = vpop.f32.mrb[121].mxu1 }
 0x21d   : > { %v3131_v27 = vadd.f32 %v1864_v63, %v1415_v0  ;;  %v1866_v52 = vpop.f32.mrb[57].mxu0  ;;  %v2215_v30 = vadd.f32 %v4644_v36, %v2214_v58 }
 0x21e   : > { %2342 = vst [vmem:[%s4783_s4 + $0x48] sm:$0xff] %v2220_v17 }
 0x21f   : > { %2341 = vst [vmem:[%s4783_s4 + $0x40] sm:$0xff] %v2215_v30  ;;  %v2767_v12 = vpop.f32.mrb[122].mxu1  ;;  %v4790_v53 = vadd.f32 %v3131_v27, %v4711_v3 }
 0x220   : > { %v1869_v32 = vpop.f32.mrb[58].mxu0  ;;  %v2230_v48 = vadd.f32 %v4662_v37, %v2767_v12  ;;  %v2224_v36 = vpop.f32.mrb[123].mxu1 }
 0x221   : > { %v3134_v41 = vadd.f32 %v1869_v32, %v1420_v6  ;;  %v1871_v35 = vpop.f32.mrb[59].mxu0  ;;  %v2225_v55 = vadd.f32 %v4656_v42, %v2224_v36  ;;  %v1430_v42 = vadd.f32 %v4634_v10, %v4629_v20 }
 0x222   : > { %2344 = vst [vmem:[%s4783_s4 + $0x58] sm:$0xff] %v2230_v48 }
 0x223   : > { %2343 = vst [vmem:[%s4783_s4 + $0x50] sm:$0xff] %v2225_v55  ;;  %v2770_v29 = vpop.f32.mrb[124].mxu1  ;;  %v4799_v46 = vadd.f32 %v3134_v41, %v4718_v60 }
 0x224   : > { %v1874_v3 = vpop.f32.mrb[60].mxu0  ;;  %v2240_v47 = vadd.f32 %v4674_v39, %v2770_v29  ;;  %v2234_v37 = vpop.f32.mrb[125].mxu1 }
 0x225   : > { %v3137_v56 = vadd.f32 %v1874_v3, %v1425_v62  ;;  %v1876_v5 = vpop.f32.mrb[61].mxu0  ;;  %v2235_v0 = vadd.f32 %v4668_v50, %v2234_v37  ;;  %v1275_v50 = vadd.f32 %v4634_v10, %v4488_v23  ;;  %v1280_v23 = vadd.f32 %v4634_v10, %v4495_v43 }
 0x226   : > { %2346 = vst [vmem:[%s4783_s4 + $0x68] sm:$0xff] %v2240_v47  ;;  %v1285_v43 = vadd.f32 %v4634_v10, %v4501_v51  ;;  %v1290_v51 = vadd.f32 %v4634_v10, %v4507_v7  ;;  %v1295_v7 = vadd.f32 %v4634_v10, %v4513_v1  ;;  %v1300_v1 = vadd.f32 %v4634_v10, %v4519_v44 }
 0x227   : > { %2345 = vst [vmem:[%s4783_s4 + $0x60] sm:$0xff] %v2235_v0  ;;  %v2773_v13 = vpop.f32.mrb[126].mxu1  ;;  %v4808_v49 = vadd.f32 %v3137_v56, %v4725_v16  ;;  %v1305_v44 = vadd.f32 %v4634_v10, %v4525_v45  ;;  %v1310_v45 = vadd.f32 %v4634_v10, %v4531_v4 }
 0x228   : > { %v1879_v60 = vpop.f32.mrb[62].mxu0  ;;  %v2250_v63 = vadd.f32 %v4686_v54, %v2773_v13  ;;  %v2244_v39 = vpop.f32.mrb[127].mxu1 }
 0x229   : > { %v3140_v17 = vadd.f32 %v1879_v60, %v1430_v42  ;;  %v1881_v58 = vpop.f32.mrb[63].mxu0  ;;  %v2245_v27 = vadd.f32 %v4680_v15, %v2244_v39 }
 0x22a   : > { %2348 = vst [vmem:[%s4783_s4 + $0x78] sm:$0xff] %v2250_v63 }
 0x22b   : > { %2347 = vst [vmem:[%s4783_s4 + $0x70] sm:$0xff] %v2245_v27  ;;  %v2776_v20 = vpop.f32.mrb[128].mxu1  ;;  %v4817_v16 = vadd.f32 %v3140_v17, %v4732_v28 }
 0x22c   : > { %v1949_v52 = vpop.f32.mrb[0].mxu0  ;;  %v2260_v54 = vadd.f32 %v4700_v11, %v2776_v20  ;;  %v2254_v30 = vpop.f32.mrb[129].mxu1 }
 0x22d   : > { %v3055_v6 = vadd.f32 %v1949_v52, %v1275_v50  ;;  %v1951_v12 = vpop.f32.mrb[1].mxu0  ;;  %v2255_v32 = vadd.f32 %v4693_v22, %v2254_v30 }
 0x22e   : > { %2350 = vst [vmem:[%s4783_s4 + $0x88] sm:$0xff] %v2260_v54 }
 0x22f   : > { %v2175_v15 = vadd.f32 %v3055_v6, %v4744_v34  ;;  %2349 = vst [vmem:[%s4783_s4 + $0x80] sm:$0xff] %v2255_v32  ;;  %v2779_v48 = vpop.f32.mrb[130].mxu1 }
 0x230   : > { %v1954_v28 = vpop.f32.mrb[2].mxu0  ;;  %v2270_v36 = vadd.f32 %v4714_v59, %v2779_v48  ;;  %v2264_v11 = vpop.f32.mrb[131].mxu1 }
 0x231   : > { %2333 = vst [vmem:[%s4783_s4] sm:$0xff] %v2175_v15  ;;  %v3057_v41 = vadd.f32 %v1954_v28, %v1280_v23  ;;  %v1956_v35 = vpop.f32.mrb[3].mxu0  ;;  %v2265_v22 = vadd.f32 %v4707_v8, %v2264_v11 }
 0x232   : > { %2352 = vst [vmem:[%s4783_s4 + $0x98] sm:$0xff] %v2270_v36 }
 0x233   : > { %v2180_v34 = vadd.f32 %v3057_v41, %v4739_v31  ;;  %2351 = vst [vmem:[%s4783_s4 + $0x90] sm:$0xff] %v2265_v22  ;;  %v2782_v55 = vpop.f32.mrb[132].mxu1 }
 0x234   : > { %v1959_v62 = vpop.f32.mrb[4].mxu0  ;;  %v2280_v59 = vadd.f32 %v4728_v40, %v2782_v55  ;;  %v2274_v29 = vpop.f32.mrb[133].mxu1 }
 0x235   : > { %2334 = vst [vmem:[%s4783_s4 + $0x8] sm:$0xff] %v2180_v34  ;;  %v3059_v3 = vadd.f32 %v1959_v62, %v1285_v43  ;;  %v1961_v47 = vpop.f32.mrb[5].mxu0  ;;  %v2275_v8 = vadd.f32 %v4721_v26, %v2274_v29 }
 0x236   : > { %2354 = vst [vmem:[%s4783_s4 + $0xa8] sm:$0xff] %v2280_v59 }
 0x237   : > { %v2185_v31 = vadd.f32 %v3059_v3, %v4753_v21  ;;  %2353 = vst [vmem:[%s4783_s4 + $0xa0] sm:$0xff] %v2275_v8  ;;  %v2785_v37 = vpop.f32.mrb[134].mxu1 }
 0x238   : > { %v1964_v56 = vpop.f32.mrb[6].mxu0  ;;  %v2290_v40 = vadd.f32 %v4742_v9, %v2785_v37  ;;  %v2284_v5 = vpop.f32.mrb[135].mxu1 }
 0x239   : > { %2335 = vst [vmem:[%s4783_s4 + $0x10] sm:$0xff] %v2185_v31  ;;  %v3061_v0 = vadd.f32 %v1964_v56, %v1290_v51  ;;  %v1966_v42 = vpop.f32.mrb[7].mxu0  ;;  %v2285_v26 = vadd.f32 %v4735_v33, %v2284_v5 }
 0x23a   : > { %2356 = vst [vmem:[%s4783_s4 + $0xb8] sm:$0xff] %v2290_v40 }
 0x23b   : > { %v2190_v21 = vadd.f32 %v3061_v0, %v4748_v57  ;;  %2355 = vst [vmem:[%s4783_s4 + $0xb0] sm:$0xff] %v2285_v26  ;;  %v2788_v13 = vpop.f32.mrb[136].mxu1 }
 0x23c   : > { %v1969_v60 = vpop.f32.mrb[8].mxu0  ;;  %v2300_v9 = vadd.f32 %v4760_v61, %v2788_v13  ;;  %v2294_v63 = vpop.f32.mrb[137].mxu1 }
 0x23d   : > { %2336 = vst [vmem:[%s4783_s4 + $0x18] sm:$0xff] %v2190_v21  ;;  %v3063_v39 = vadd.f32 %v1969_v60, %v1295_v7  ;;  %v1971_v17 = vpop.f32.mrb[9].mxu0  ;;  %v2295_v33 = vadd.f32 %v4751_v2, %v2294_v63 }
 0x23e   : > { %2358 = vst [vmem:[%s4783_s4 + $0xc8] sm:$0xff] %v2300_v9 }
 0x23f   : > { %v2195_v57 = vadd.f32 %v3063_v39, %v4762_v24  ;;  %2357 = vst [vmem:[%s4783_s4 + $0xc0] sm:$0xff] %v2295_v33  ;;  %v2791_v58 = vpop.f32.mrb[138].mxu1 }
 0x240   : > { %v1974_v27 = vpop.f32.mrb[10].mxu0  ;;  %v2310_v61 = vadd.f32 %v4779_v18, %v2791_v58  ;;  %v2304_v50 = vpop.f32.mrb[139].mxu1 }
 0x241   : > { %2337 = vst [vmem:[%s4783_s4 + $0x20] sm:$0xff] %v2195_v57  ;;  %v3065_v20 = vadd.f32 %v1974_v27, %v1300_v1  ;;  %v1976_v52 = vpop.f32.mrb[11].mxu0  ;;  %v2305_v2 = vadd.f32 %v4770_v25, %v2304_v50 }
 0x242   : > { %2360 = vst [vmem:[%s4783_s4 + $0xd8] sm:$0xff] %v2310_v61 }
 0x243   : > { %v2200_v24 = vadd.f32 %v3065_v20, %v4757_v38  ;;  %2359 = vst [vmem:[%s4783_s4 + $0xd0] sm:$0xff] %v2305_v2  ;;  %v2794_v54 = vpop.f32.mrb[140].mxu1 }
 0x244   : > { %v1979_v30 = vpop.f32.mrb[12].mxu0  ;;  %v2320_v18 = vadd.f32 %v4799_v46, %v2794_v54  ;;  %v2314_v6 = vpop.f32.mrb[141].mxu1 }
 0x245   : > { %2338 = vst [vmem:[%s4783_s4 + $0x28] sm:$0xff] %v2200_v24  ;;  %v3067_v12 = vadd.f32 %v1979_v30, %v1305_v44  ;;  %v1981_v32 = vpop.f32.mrb[13].mxu0  ;;  %v2315_v25 = vadd.f32 %v4790_v53, %v2314_v6 }
 0x246   : > { %2362 = vst [vmem:[%s4783_s4 + $0xe8] sm:$0xff] %v2320_v18 }
 0x247   : > { %v2205_v38 = vadd.f32 %v3067_v12, %v4772_v19  ;;  %2361 = vst [vmem:[%s4783_s4 + $0xe0] sm:$0xff] %v2315_v25  ;;  %v2797_v23 = vpop.f32.mrb[142].mxu1 }
 0x248   : > { %v1984_v46 = vpop.f32.mrb[14].mxu0  ;;  %v2330_v15 = vadd.f32 %v4817_v16, %v2797_v23  ;;  %v2324_v48 = vpop.f32.mrb[143].mxu1 }
 0x249   : > { %2339 = vst [vmem:[%s4783_s4 + $0x30] sm:$0xff] %v2205_v38  ;;  %v3069_v53 = vadd.f32 %v1984_v46, %v1310_v45  ;;  %v1986_v28 = vpop.f32.mrb[15].mxu0  ;;  %v2325_v36 = vadd.f32 %v4808_v49, %v2324_v48 }
 0x24a   : > { %2364 = vst [vmem:[%s4783_s4 + $0xf8] sm:$0xff] %v2330_v15 }
 0x24b   : > { %v2210_v4 = vadd.f32 %v3069_v53, %v4767_v14  ;;  %2363 = vst [vmem:[%s4783_s4 + $0xf0] sm:$0xff] %v2325_v36 }
 0x24d   : > { %2340 = vst [vmem:[%s4783_s4 + $0x38] sm:$0xff] %v2210_v4 }
 0x24e   : > { %3294 = shalt.err (!%p3291_p5)
}
 0x24f   : > { %s3295_s21 = scalar_lea.hbm %s4883_s9, 4096  ;;  %s3299_s27 = scalar_lea.hbm %s4941_s3, 8192 }
 0x250   : > { %p3296_p6 = scmp.ne.s32.totalorder %s4883_s9, %s3295_s21  ;;  %p3300_p10 = scmp.lt.u32.totalorder %s4883_s9, %s4941_s3 }
 0x251   : > { %p3301_p11 = scmp.lt.u32.totalorder %s3299_s27, %s3295_s21  ;;  %p3303_p13 = scmp.lt.u32.totalorder %s3295_s21, %s4883_s9 }
 0x252   : > { %p3297_p7 = pnand %p3296_p6, %p3425_p4 }
 0x253   : > { %p3302_p12 = por %p3301_p11, %p3300_p10 }
 0x254   : > { %p3298_p9 = pneg %p3297_p7 }
 0x255   : > { %p3304_p0 = por %p3303_p13, %p3302_p12 }
 0x257   : > { %p3305_p1 = pnand %p3304_p0, %p3298_p9 }
 0x259   : > { %3308 = shalt.err (!%p3305_p1)
}
 0x25a   : > { %s3363_s30 = smov 128   ;;  %s3364_s4 = smov 8  }
 0x25b   : > { %3223 = dma.vmem_to_hbm [thread:$0]  (%p3425_p4), %s4885_s7, 4096, %s4883_s9, %s4892_s15, %s3363_s30, %s3363_s30, %s3364_s4  }
 0x25c PF: > { %p3229_p2 = scmp.ge.s32.totalorder %s3359_s17, 2  ;;  %s2396_s5 = sand.u32 1, %s3339_s12  }
 0x25d   : > { %s2397_s6 = scalar_lea.sflag [#allocation4], %s2396_s5 }
 0x25e   : > { %p3226_p3 = pnand %p3229_p2, %p3432_p8 }
 0x260   : > { %3334 = dma.done.wait (!%p3226_p3), %s2397_s6, 4096  }
 0x261   : > { %3336 = vsyncadd (!%p3226_p3), %s2397_s6, 4294963200  ;;  %s16_s17 = sadd.s32 1, %s3359_s17   ;;  %s5084_s12 = smov %s3343_s13 }
 0x262   : > { %p13_p5 = scmp.ge.s32.totalorder %s16_s17, 4   ;;  %s5085_s13 = smov %s3347_s14 }
 0x263   : > { %s5086_s14 = smov %s3438_s25  ;;  %s5087_s15 = smov %s3355_s16 }
 0x264   : > { %s5088_s16 = smov %s5090_s20  ;;  %15 = sbr.rel (!%p13_p5) target bundleno = 4 (0x4), region = 70 }
 0x26b   :  { %2402 = vsyncpa [#allocation4], 1 }
 0x26c   :  { %2404 = vsyncpa [#allocation4 + $0x1], 1 }

</bundles_post_ra>
